<compile_context>
chip_gen: v7x
topology: tpu7x:2x2x1
jax: 0.10.0
libtpu: 0.0.40
codegen_flags: <defaults>
</compile_context>

<pallas_src>
import math

import jax
import jax.numpy as jnp
import numpy as np
from jax import lax
from jax.experimental import pallas as pl
from jax.experimental.pallas import tpu as pltpu

D_MODEL = 32
NUM_HEADS = 4
HEAD_DIM = D_MODEL // NUM_HEADS
EPS = 1e-5                      # nn.LayerNorm default
LANE = 128
MXU_DTYPE = jnp.bfloat16        # MXU operands only; VPU/EUP math stays f32

# ---- bf16 matrix slab layout: 128 rows (contraction dim, zero past D); every segment
# ---- is 128 lanes wide so all in-kernel slices start on vreg lane boundaries.
SA_QK_OFF = 0                        # 8 segs: self Q heads 0..3 then self K heads 0..3
CA_Q_OFF = SA_QK_OFF + 8 * LANE      # 4 segs: cross Q heads
CA_K_OFF = CA_Q_OFF + 4 * LANE       # 4 segs: cross K heads
SA_WVO_OFF = CA_K_OFF + 4 * LANE     # 4 segs: fused self V*W_o per head
CA_WVO_OFF = SA_WVO_OFF + 4 * LANE   # 4 segs: fused cross V*W_o per head
W1_OFF = CA_WVO_OFF + 4 * LANE       # 1 seg : FFN lin1 (D x 4D)
W2T_OFF = W1_OFF + LANE              # 1 seg : FFN lin2^T (4D x D, lane padded)
MAT_LANES = W2T_OFF + LANE

# ---- f32 bias / LayerNorm slab: one vector per row, zero-padded to 8*128 lanes.
R_SA_BQK, R_CA_BQ, R_CA_BK = 0, 1, 2
R_SA_BVO, R_CA_BVO = 3, 4
R_LN1_G, R_LN1_B, R_B1, R_B2 = 5, 6, 7, 8
R_LNF_G, R_LNF_B, R_MASK = 9, 10, 11
N_VEC_ROWS, VEC_W = 12, 8 * LANE


# ------------------------------------------------------- in-kernel math utils
def _layernorm_padded(x, g, b, mask):
    """LayerNorm over the first D_MODEL lanes of a 128-lane-padded f32 tile.

    x: (N, 128) with lanes D..127 exactly zero; g, b, mask: (1, 128) (zero past D).
    Result keeps the padded lanes at zero (g/b are zero there).
    """
    mu = jnp.sum(x, axis=-1, keepdims=True) * (1.0 / D_MODEL)
    xc = (x - mu) * mask
    var = jnp.sum(xc * xc, axis=-1, keepdims=True) * (1.0 / D_MODEL)
    return xc * lax.rsqrt(var + EPS) * g + b


def _mha(q_all, k_all, kv_b, mat_ref, wvo_off, bvo):
    """Multi-head attention with 128-lane-aligned per-head segments.

    q_all: (N, 4*128) f32 (softmax scale already folded into Q), k_all: (M, 4*128) f32,
    kv_b: (M, 128) bf16 padded key/value input, wvo_off: slab offset of the fused
    per-head V*W_o weights, bvo: (1, 128) combined value/output bias.
    Heads are combined by accumulation (no lane concat / relayout).
    """
    out = bvo
    for h in range(NUM_HEADS):
        qh = q_all[:, h * LANE:(h + 1) * LANE].astype(MXU_DTYPE)
        kh = k_all[:, h * LANE:(h + 1) * LANE].astype(MXU_DTYPE)
        s = lax.dot_general(qh, kh, (((1,), (1,)), ((), ())),
                            preferred_element_type=jnp.float32)   # (N, M)
        s = s - jnp.max(s, axis=-1, keepdims=True)
        pr = jnp.exp(s)
        pr = pr * pl.reciprocal(jnp.sum(pr, axis=-1, keepdims=True), approx=True)
        ctx = jnp.dot(pr.astype(MXU_DTYPE), kv_b,
                      preferred_element_type=jnp.float32)          # (N, 128)
        wvo = mat_ref[:, wvo_off + h * LANE: wvo_off + (h + 1) * LANE]
        out = out + jnp.dot(ctx.astype(MXU_DTYPE), wvo,
                            preferred_element_type=jnp.float32)
    return out


# --------------------------------------------------------------------- kernel
def _decoder_kernel(tgt_ref, mem_ref, mat_ref, vec_ref, o_ref):
    x = tgt_ref[0]                    # (T, 128) f32, lanes D..127 zero
    mem = mem_ref[0]                  # (S, 128) f32
    xb = x.astype(MXU_DTYPE)
    memb = mem.astype(MXU_DTYPE)

    def vrow(r, w):                   # (1, w) bias / LN vector, lane-aligned
        return vec_ref[r:r + 1, 0:w]

    # --- self-attention (fused per-head Q/K projection) + residual -------------
    qk = jnp.dot(xb, mat_ref[:, SA_QK_OFF:SA_QK_OFF + 8 * LANE],
                 preferred_element_type=jnp.float32) + vrow(R_SA_BQK, 8 * LANE)
    x = x + _mha(qk[:, :4 * LANE], qk[:, 4 * LANE:], xb, mat_ref,
                 SA_WVO_OFF, vrow(R_SA_BVO, LANE))

    # --- cross-attention + residual --------------------------------------------
    q = jnp.dot(x.astype(MXU_DTYPE), mat_ref[:, CA_Q_OFF:CA_Q_OFF + 4 * LANE],
                preferred_element_type=jnp.float32) + vrow(R_CA_BQ, 4 * LANE)
    k = jnp.dot(memb, mat_ref[:, CA_K_OFF:CA_K_OFF + 4 * LANE],
                preferred_element_type=jnp.float32) + vrow(R_CA_BK, 4 * LANE)
    x = x + _mha(q, k, memb, mat_ref, CA_WVO_OFF, vrow(R_CA_BVO, LANE))

    # --- FFN: LayerNorm -> Linear(4D) -> ReLU -> Linear(D) + residual ----------
    # TODO(synk): nn.Dropout is identity here (inference semantics, no RNG path).
    mask = vrow(R_MASK, LANE)
    h = _layernorm_padded(x, vrow(R_LN1_G, LANE), vrow(R_LN1_B, LANE), mask)
    h = jnp.dot(h.astype(MXU_DTYPE), mat_ref[:, W1_OFF:W1_OFF + LANE],
                preferred_element_type=jnp.float32) + vrow(R_B1, LANE)
    h = jnp.maximum(h, 0.0)
    h = jnp.dot(h.astype(MXU_DTYPE), mat_ref[:, W2T_OFF:W2T_OFF + LANE],
                preferred_element_type=jnp.float32) + vrow(R_B2, LANE)
    x = x + h

    # --- final LayerNorm, stored lane-dense (128 lanes); wrapper slices to D ---
    o_ref[0] = _layernorm_padded(x, vrow(R_LNF_G, LANE), vrow(R_LNF_B, LANE), mask)


# ------------------------------------------------------------------- wrapper
def transformer_decoder_block(tgt, memory, mat, vec):
    B, T, D = tgt.shape
    S = memory.shape[1]
    assert D == D_MODEL
    tgt_p = jnp.pad(tgt, ((0, 0), (0, 0), (0, LANE - D)))
    mem_p = jnp.pad(memory, ((0, 0), (0, 0), (0, LANE - D)))

    flops = 2 * B * (
        T * LANE * 8 * LANE                                  # self fused Q/K proj
        + T * LANE * 4 * LANE + S * LANE * 4 * LANE          # cross Q / K proj
        + NUM_HEADS * (2 * T * T * LANE + T * LANE * LANE)   # self scores+ctx+VO
        + NUM_HEADS * (2 * T * S * LANE + T * LANE * LANE)   # cross scores+ctx+VO
        + 2 * T * LANE * LANE)                               # FFN
    transcendentals = B * (NUM_HEADS * (T * T + T * S) + 3 * T)
    bytes_accessed = (tgt_p.size * 4 + mem_p.size * 4 + B * T * LANE * 4
                      + mat.size * mat.dtype.itemsize + vec.size * 4)

    out = pl.pallas_call(
        _decoder_kernel,
        out_shape=jax.ShapeDtypeStruct((B, T, LANE), jnp.float32),
        grid=(B,),
        in_specs=[
            pl.BlockSpec((1, T, LANE), lambda b: (b, 0, 0)),
            pl.BlockSpec((1, S, LANE), lambda b: (b, 0, 0)),
            pl.BlockSpec(mat.shape, lambda b: (0, 0)),
            pl.BlockSpec(vec.shape, lambda b: (0, 0)),
        ],
        out_specs=pl.BlockSpec((1, T, LANE), lambda b: (b, 0, 0)),
        compiler_params=pltpu.CompilerParams(
            dimension_semantics=("parallel",)),
        cost_estimate=pl.CostEstimate(
            flops=flops, transcendentals=transcendentals,
            bytes_accessed=bytes_accessed),
    )(tgt_p, mem_p, mat, vec)
    return out[:, :, :D]


# --------------------------------------------- PyTorch-layout params + packing
def init_params(key, d_model=D_MODEL):
    ks = iter(jax.random.split(key, 16))

    def w(shape, scale=0.02):
        return (scale * jax.random.normal(next(ks), shape)).astype(jnp.float32)

    def mha(prefix):
        return {
            f"{prefix}.in_proj_weight": w((3 * d_model, d_model)),
            f"{prefix}.in_proj_bias": w((3 * d_model,), 0.01),
            f"{prefix}.out_proj.weight": w((d_model, d_model)),
            f"{prefix}.out_proj.bias": w((d_model,), 0.01),
        }

    p = {}
    p.update(mha("self_attn"))
    p.update(mha("cross_attn"))
    p["ffn.ln.weight"] = jnp.ones((d_model,), jnp.float32)
    p["ffn.ln.bias"] = jnp.zeros((d_model,), jnp.float32)
    p["ffn.lin1.weight"] = w((4 * d_model, d_model))
    p["ffn.lin1.bias"] = w((4 * d_model,), 0.01)
    p["ffn.lin2.weight"] = w((d_model, 4 * d_model))
    p["ffn.lin2.bias"] = w((d_model,), 0.01)
    p["norm.weight"] = jnp.ones((d_model,), jnp.float32)
    p["norm.bias"] = jnp.zeros((d_model,), jnp.float32)
    return p


def pack_params(p, d_model=D_MODEL):
    """PyTorch-layout params -> (bf16 matrix slab (128, 26*128), f32 vec slab (12, 1024))."""
    d, hd, H = d_model, HEAD_DIM, NUM_HEADS
    scale = 1.0 / math.sqrt(hd)
    mat = np.zeros((LANE, MAT_LANES), np.float32)
    vec = np.zeros((N_VEC_ROWS, VEC_W), np.float32)

    def pack_attn(prefix, q_off, k_off, vo_off, bq_loc, bk_loc, bvo_row):
        win = np.asarray(p[f"{prefix}.in_proj_weight"], np.float32)
        b_in = np.asarray(p[f"{prefix}.in_proj_bias"], np.float32)
        wo = np.asarray(p[f"{prefix}.out_proj.weight"], np.float32)
        bo = np.asarray(p[f"{prefix}.out_proj.bias"], np.float32)
        wq, wk, wv = win[:d], win[d:2 * d], win[2 * d:]
        bq, bk, bv = b_in[:d], b_in[d:2 * d], b_in[2 * d:]
        for h in range(H):
            sl = slice(h * hd, (h + 1) * hd)
            # per-head Q (softmax scale folded) / K projections, 128-lane segments
            mat[:d, q_off + h * LANE: q_off + h * LANE + hd] = (wq[sl] * scale).T
            mat[:d, k_off + h * LANE: k_off + h * LANE + hd] = wk[sl].T
            # fused per-head value+output projection: ctx @ (Wv_h^T @ Wo_h)
            mat[:d, vo_off + h * LANE: vo_off + h * LANE + d] = wv[sl].T @ wo[:, sl].T
            r, base = bq_loc
            vec[r, base + h * LANE: base + h * LANE + hd] = bq[sl] * scale
            r, base = bk_loc
            vec[r, base + h * LANE: base + h * LANE + hd] = bk[sl]
        # value bias routed through W_o (softmax rows sum to 1) + output bias
        vec[bvo_row, :d] = bo + bv @ wo.T

    pack_attn("self_attn", SA_QK_OFF, SA_QK_OFF + 4 * LANE, SA_WVO_OFF,
              (R_SA_BQK, 0), (R_SA_BQK, 4 * LANE), R_SA_BVO)
    pack_attn("cross_attn", CA_Q_OFF, CA_K_OFF, CA_WVO_OFF,
              (R_CA_BQ, 0), (R_CA_BK, 0), R_CA_BVO)

    mat[:d, W1_OFF:W1_OFF + 4 * d] = np.asarray(p["ffn.lin1.weight"], np.float32).T
    mat[:4 * d, W2T_OFF:W2T_OFF + d] = np.asarray(p["ffn.lin2.weight"], np.float32).T
    vec[R_LN1_G, :d] = np.asarray(p["ffn.ln.weight"], np.float32)
    vec[R_LN1_B, :d] = np.asarray(p["ffn.ln.bias"], np.float32)
    vec[R_B1, :4 * d] = np.asarray(p["ffn.lin1.bias"], np.float32)
    vec[R_B2, :d] = np.asarray(p["ffn.lin2.bias"], np.float32)
    vec[R_LNF_G, :d] = np.asarray(p["norm.weight"], np.float32)
    vec[R_LNF_B, :d] = np.asarray(p["norm.bias"], np.float32)
    vec[R_MASK, :d] = 1.0
    return jnp.asarray(mat, MXU_DTYPE), jnp.asarray(vec, jnp.float32)


# ------------------------------------------------------------- plain-JAX ref
def reference_block(tgt, memory, p):
    d = tgt.shape[-1]
    hd = d // NUM_HEADS

    def mha(q_in, kv_in, w_in, b_in, w_out, b_out):
        q = q_in @ w_in[:d].T + b_in[:d]
        k = kv_in @ w_in[d:2 * d].T + b_in[d:2 * d]
        v = kv_in @ w_in[2 * d:].T + b_in[2 * d:]
        tq, tk = q.shape[0], k.shape[0]
        q = q.reshape(tq, NUM_HEADS, hd).transpose(1, 0, 2)
        k = k.reshape(tk, NUM_HEADS, hd).transpose(1, 0, 2)
        v = v.reshape(tk, NUM_HEADS, hd).transpose(1, 0, 2)
        s = jnp.einsum("hqd,hkd->hqk", q, k) / np.sqrt(hd)
        a = jax.nn.softmax(s, axis=-1)
        o = jnp.einsum("hqk,hkd->hqd", a, v).transpose(1, 0, 2).reshape(tq, d)
        return o @ w_out.T + b_out

    def ln(x, g, b):
        mu = x.mean(-1, keepdims=True)
        var = ((x - mu) ** 2).mean(-1, keepdims=True)
        return (x - mu) / jnp.sqrt(var + EPS) * g + b

    def one(x, mem):
        x = x + mha(x, x,
                    p["self_attn.in_proj_weight"], p["self_attn.in_proj_bias"],
                    p["self_attn.out_proj.weight"], p["self_attn.out_proj.bias"])
        x = x + mha(x, mem,
                    p["cross_attn.in_proj_weight"], p["cross_attn.in_proj_bias"],
                    p["cross_attn.out_proj.weight"], p["cross_attn.out_proj.bias"])
        h = ln(x, p["ffn.ln.weight"], p["ffn.ln.bias"])
        h = jnp.maximum(h @ p["ffn.lin1.weight"].T + p["ffn.lin1.bias"], 0.0)
        h = h @ p["ffn.lin2.weight"].T + p["ffn.lin2.bias"]
        x = x + h
        return ln(x, p["norm.weight"], p["norm.bias"])

    return jax.vmap(one)(tgt, memory)


# ------------------------------------------------------------------- main ---
if __name__ == "__main__":
    B, T_TGT, T_SRC = 2, 8, 16

    key = jax.random.PRNGKey(0)
    k_tgt, k_mem, k_par = jax.random.split(key, 3)

    tgt = jax.random.normal(k_tgt, (B, T_TGT, D_MODEL), dtype=jnp.float32)
    memory = jax.random.normal(k_mem, (B, T_SRC, D_MODEL), dtype=jnp.float32)

    params = init_params(k_par)
    mat, vec = pack_params(params)

    out = jax.block_until_ready(transformer_decoder_block(tgt, memory, mat, vec))
    ref = jax.block_until_ready(reference_block(tgt, memory, params))

    assert out.shape == (B, T_TGT, D_MODEL)
    # tolerance covers bf16 MXU operands + the EUP approximate-reciprocal softmax denom
    np.testing.assert_allclose(np.asarray(out), np.asarray(ref),
                               rtol=1e-2, atol=1e-2)
    print("KERNEL_OK")
</pallas_src>

<mosaic_0001>
module attributes {stable_mosaic.version = 11 : i64} {
  func.func @_decoder_kernel(%arg0: i32, %arg1: memref<1x8x128xf32, #tpu.memory_space<vmem>>, %arg2: memref<1x16x128xf32, #tpu.memory_space<vmem>>, %arg3: memref<128x3328xbf16, #tpu.memory_space<vmem>>, %arg4: memref<12x1024xf32, #tpu.memory_space<vmem>>, %arg5: memref<1x8x128xf32, #tpu.memory_space<vmem>>) attributes {dimension_semantics = [#tpu.dimension_semantics<parallel>], iteration_bounds = array<i64: 2>, scalar_prefetch = 0 : i64, scratch_operands = 0 : i64, tpu.core_type = #tpu.core_type<tc>, window_params = [{transform_indices = @transform_0, window_bounds = array<i64: 1, 8, 128>}, {transform_indices = @transform_1, window_bounds = array<i64: 1, 16, 128>}, {pipeline_mode = #tpu.pipeline_mode<synchronous>, transform_indices = @transform_2, window_bounds = array<i64: 128, 3328>}, {pipeline_mode = #tpu.pipeline_mode<synchronous>, transform_indices = @transform_3, window_bounds = array<i64: 12, 1024>}, {transform_indices = @transform_4, window_bounds = array<i64: 1, 8, 128>}]} {
    %c0 = arith.constant 0 : index
    %c0_0 = arith.constant 0 : index
    %c0_1 = arith.constant 0 : index
    %0 = vector.load %arg1[%c0, %c0_0, %c0_1] : memref<1x8x128xf32, #tpu.memory_space<vmem>>, vector<1x8x128xf32>
    %1 = vector.shape_cast %0 : vector<1x8x128xf32> to vector<8x128xf32>
    %c0_2 = arith.constant 0 : index
    %c0_3 = arith.constant 0 : index
    %c0_4 = arith.constant 0 : index
    %2 = vector.load %arg2[%c0_2, %c0_3, %c0_4] : memref<1x16x128xf32, #tpu.memory_space<vmem>>, vector<1x16x128xf32>
    %3 = vector.shape_cast %2 : vector<1x16x128xf32> to vector<16x128xf32>
    %4 = arith.truncf %1 : vector<8x128xf32> to vector<8x128xbf16>
    %5 = arith.truncf %3 : vector<16x128xf32> to vector<16x128xbf16>
    %c0_5 = arith.constant 0 : index
    %c0_6 = arith.constant 0 : index
    %6 = vector.load %arg3[%c0_5, %c0_6] : memref<128x3328xbf16, #tpu.memory_space<vmem>>, vector<128x1024xbf16>
    %cst = arith.constant dense<0.000000e+00> : vector<8x1024xf32>
    %7 = tpu.matmul %4, %6, %cst {dimension_numbers = #tpu.dot_dimension_numbers<[1], [0], [0], [1], [0, 0, 1, 1], [], []>} : vector<8x128xbf16>, vector<128x1024xbf16>, vector<8x1024xf32> -> vector<8x1024xf32>
    %c0_7 = arith.constant 0 : index
    %c0_8 = arith.constant 0 : index
    %8 = vector.load %arg4[%c0_7, %c0_8] : memref<12x1024xf32, #tpu.memory_space<vmem>>, vector<1x1024xf32>
    %9 = vector.broadcast %8 : vector<1x1024xf32> to vector<8x1024xf32>
    %10 = arith.addf %7, %9 : vector<8x1024xf32>
    %11 = vector.extract_strided_slice %10 {offsets = [0, 0], sizes = [8, 512], strides = [1, 1]} : vector<8x1024xf32> to vector<8x512xf32>
    %12 = vector.extract_strided_slice %10 {offsets = [0, 512], sizes = [8, 512], strides = [1, 1]} : vector<8x1024xf32> to vector<8x512xf32>
    %c3 = arith.constant 3 : index
    %c0_9 = arith.constant 0 : index
    %13 = vector.load %arg4[%c3, %c0_9] : memref<12x1024xf32, #tpu.memory_space<vmem>>, vector<1x128xf32>
    %14 = vector.extract_strided_slice %11 {offsets = [0, 0], sizes = [8, 128], strides = [1, 1]} : vector<8x512xf32> to vector<8x128xf32>
    %15 = arith.truncf %14 : vector<8x128xf32> to vector<8x128xbf16>
    %16 = vector.extract_strided_slice %12 {offsets = [0, 0], sizes = [8, 128], strides = [1, 1]} : vector<8x512xf32> to vector<8x128xf32>
    %17 = arith.truncf %16 : vector<8x128xf32> to vector<8x128xbf16>
    %cst_10 = arith.constant dense<0.000000e+00> : vector<8x8xf32>
    %18 = tpu.matmul %15, %17, %cst_10 {dimension_numbers = #tpu.dot_dimension_numbers<[1], [1], [0], [0], [0, 0, 1, 0], [], []>} : vector<8x128xbf16>, vector<8x128xbf16>, vector<8x8xf32> -> vector<8x8xf32>
    %cst_11 = arith.constant dense<0xFF800000> : vector<8xf32>
    %19 = vector.multi_reduction <maximumf>, %18, %cst_11 [1] : vector<8x8xf32> to vector<8xf32>
    %20 = vector.shape_cast %19 : vector<8xf32> to vector<8x1xf32>
    %21 = vector.broadcast %20 : vector<8x1xf32> to vector<8x8xf32>
    %22 = arith.subf %18, %21 : vector<8x8xf32>
    %23 = math.exp %22 : vector<8x8xf32>
    %cst_12 = arith.constant dense<0.000000e+00> : vector<8xf32>
    %24 = vector.multi_reduction <add>, %23, %cst_12 [1] : vector<8x8xf32> to vector<8xf32>
    %25 = vector.shape_cast %24 : vector<8xf32> to vector<8x1xf32>
    %26 = tpu.reciprocal %25 {approx = true} : vector<8x1xf32> -> vector<8x1xf32>
    %27 = vector.broadcast %26 : vector<8x1xf32> to vector<8x8xf32>
    %28 = arith.mulf %23, %27 : vector<8x8xf32>
    %29 = arith.truncf %28 : vector<8x8xf32> to vector<8x8xbf16>
    %cst_13 = arith.constant dense<0.000000e+00> : vector<8x128xf32>
    %30 = tpu.matmul %29, %4, %cst_13 {dimension_numbers = #tpu.dot_dimension_numbers<[1], [0], [0], [1], [0, 0, 1, 1], [], []>} : vector<8x8xbf16>, vector<8x128xbf16>, vector<8x128xf32> -> vector<8x128xf32>
    %c0_14 = arith.constant 0 : index
    %c2048 = arith.constant 2048 : index
    %31 = vector.load %arg3[%c0_14, %c2048] : memref<128x3328xbf16, #tpu.memory_space<vmem>>, vector<128x128xbf16>
    %32 = arith.truncf %30 : vector<8x128xf32> to vector<8x128xbf16>
    %cst_15 = arith.constant dense<0.000000e+00> : vector<8x128xf32>
    %33 = tpu.matmul %32, %31, %cst_15 {dimension_numbers = #tpu.dot_dimension_numbers<[1], [0], [0], [1], [0, 0, 1, 1], [], []>} : vector<8x128xbf16>, vector<128x128xbf16>, vector<8x128xf32> -> vector<8x128xf32>
    %34 = vector.broadcast %13 : vector<1x128xf32> to vector<8x128xf32>
    %35 = arith.addf %34, %33 : vector<8x128xf32>
    %36 = vector.extract_strided_slice %11 {offsets = [0, 128], sizes = [8, 128], strides = [1, 1]} : vector<8x512xf32> to vector<8x128xf32>
    %37 = arith.truncf %36 : vector<8x128xf32> to vector<8x128xbf16>
    %38 = vector.extract_strided_slice %12 {offsets = [0, 128], sizes = [8, 128], strides = [1, 1]} : vector<8x512xf32> to vector<8x128xf32>
    %39 = arith.truncf %38 : vector<8x128xf32> to vector<8x128xbf16>
    %cst_16 = arith.constant dense<0.000000e+00> : vector<8x8xf32>
    %40 = tpu.matmul %37, %39, %cst_16 {dimension_numbers = #tpu.dot_dimension_numbers<[1], [1], [0], [0], [0, 0, 1, 0], [], []>} : vector<8x128xbf16>, vector<8x128xbf16>, vector<8x8xf32> -> vector<8x8xf32>
    %cst_17 = arith.constant dense<0xFF800000> : vector<8xf32>
    %41 = vector.multi_reduction <maximumf>, %40, %cst_17 [1] : vector<8x8xf32> to vector<8xf32>
    %42 = vector.shape_cast %41 : vector<8xf32> to vector<8x1xf32>
    %43 = vector.broadcast %42 : vector<8x1xf32> to vector<8x8xf32>
    %44 = arith.subf %40, %43 : vector<8x8xf32>
    %45 = math.exp %44 : vector<8x8xf32>
    %cst_18 = arith.constant dense<0.000000e+00> : vector<8xf32>
    %46 = vector.multi_reduction <add>, %45, %cst_18 [1] : vector<8x8xf32> to vector<8xf32>
    %47 = vector.shape_cast %46 : vector<8xf32> to vector<8x1xf32>
    %48 = tpu.reciprocal %47 {approx = true} : vector<8x1xf32> -> vector<8x1xf32>
    %49 = vector.broadcast %48 : vector<8x1xf32> to vector<8x8xf32>
    %50 = arith.mulf %45, %49 : vector<8x8xf32>
    %51 = arith.truncf %50 : vector<8x8xf32> to vector<8x8xbf16>
    %cst_19 = arith.constant dense<0.000000e+00> : vector<8x128xf32>
    %52 = tpu.matmul %51, %4, %cst_19 {dimension_numbers = #tpu.dot_dimension_numbers<[1], [0], [0], [1], [0, 0, 1, 1], [], []>} : vector<8x8xbf16>, vector<8x128xbf16>, vector<8x128xf32> -> vector<8x128xf32>
    %c0_20 = arith.constant 0 : index
    %c2176 = arith.constant 2176 : index
    %53 = vector.load %arg3[%c0_20, %c2176] : memref<128x3328xbf16, #tpu.memory_space<vmem>>, vector<128x128xbf16>
    %54 = arith.truncf %52 : vector<8x128xf32> to vector<8x128xbf16>
    %cst_21 = arith.constant dense<0.000000e+00> : vector<8x128xf32>
    %55 = tpu.matmul %54, %53, %cst_21 {dimension_numbers = #tpu.dot_dimension_numbers<[1], [0], [0], [1], [0, 0, 1, 1], [], []>} : vector<8x128xbf16>, vector<128x128xbf16>, vector<8x128xf32> -> vector<8x128xf32>
    %56 = arith.addf %35, %55 : vector<8x128xf32>
    %57 = vector.extract_strided_slice %11 {offsets = [0, 256], sizes = [8, 128], strides = [1, 1]} : vector<8x512xf32> to vector<8x128xf32>
    %58 = arith.truncf %57 : vector<8x128xf32> to vector<8x128xbf16>
    %59 = vector.extract_strided_slice %12 {offsets = [0, 256], sizes = [8, 128], strides = [1, 1]} : vector<8x512xf32> to vector<8x128xf32>
    %60 = arith.truncf %59 : vector<8x128xf32> to vector<8x128xbf16>
    %cst_22 = arith.constant dense<0.000000e+00> : vector<8x8xf32>
    %61 = tpu.matmul %58, %60, %cst_22 {dimension_numbers = #tpu.dot_dimension_numbers<[1], [1], [0], [0], [0, 0, 1, 0], [], []>} : vector<8x128xbf16>, vector<8x128xbf16>, vector<8x8xf32> -> vector<8x8xf32>
    %cst_23 = arith.constant dense<0xFF800000> : vector<8xf32>
    %62 = vector.multi_reduction <maximumf>, %61, %cst_23 [1] : vector<8x8xf32> to vector<8xf32>
    %63 = vector.shape_cast %62 : vector<8xf32> to vector<8x1xf32>
    %64 = vector.broadcast %63 : vector<8x1xf32> to vector<8x8xf32>
    %65 = arith.subf %61, %64 : vector<8x8xf32>
    %66 = math.exp %65 : vector<8x8xf32>
    %cst_24 = arith.constant dense<0.000000e+00> : vector<8xf32>
    %67 = vector.multi_reduction <add>, %66, %cst_24 [1] : vector<8x8xf32> to vector<8xf32>
    %68 = vector.shape_cast %67 : vector<8xf32> to vector<8x1xf32>
    %69 = tpu.reciprocal %68 {approx = true} : vector<8x1xf32> -> vector<8x1xf32>
    %70 = vector.broadcast %69 : vector<8x1xf32> to vector<8x8xf32>
    %71 = arith.mulf %66, %70 : vector<8x8xf32>
    %72 = arith.truncf %71 : vector<8x8xf32> to vector<8x8xbf16>
    %cst_25 = arith.constant dense<0.000000e+00> : vector<8x128xf32>
    %73 = tpu.matmul %72, %4, %cst_25 {dimension_numbers = #tpu.dot_dimension_numbers<[1], [0], [0], [1], [0, 0, 1, 1], [], []>} : vector<8x8xbf16>, vector<8x128xbf16>, vector<8x128xf32> -> vector<8x128xf32>
    %c0_26 = arith.constant 0 : index
    %c2304 = arith.constant 2304 : index
    %74 = vector.load %arg3[%c0_26, %c2304] : memref<128x3328xbf16, #tpu.memory_space<vmem>>, vector<128x128xbf16>
    %75 = arith.truncf %73 : vector<8x128xf32> to vector<8x128xbf16>
    %cst_27 = arith.constant dense<0.000000e+00> : vector<8x128xf32>
    %76 = tpu.matmul %75, %74, %cst_27 {dimension_numbers = #tpu.dot_dimension_numbers<[1], [0], [0], [1], [0, 0, 1, 1], [], []>} : vector<8x128xbf16>, vector<128x128xbf16>, vector<8x128xf32> -> vector<8x128xf32>
    %77 = arith.addf %56, %76 : vector<8x128xf32>
    %78 = vector.extract_strided_slice %11 {offsets = [0, 384], sizes = [8, 128], strides = [1, 1]} : vector<8x512xf32> to vector<8x128xf32>
    %79 = arith.truncf %78 : vector<8x128xf32> to vector<8x128xbf16>
    %80 = vector.extract_strided_slice %12 {offsets = [0, 384], sizes = [8, 128], strides = [1, 1]} : vector<8x512xf32> to vector<8x128xf32>
    %81 = arith.truncf %80 : vector<8x128xf32> to vector<8x128xbf16>
    %cst_28 = arith.constant dense<0.000000e+00> : vector<8x8xf32>
    %82 = tpu.matmul %79, %81, %cst_28 {dimension_numbers = #tpu.dot_dimension_numbers<[1], [1], [0], [0], [0, 0, 1, 0], [], []>} : vector<8x128xbf16>, vector<8x128xbf16>, vector<8x8xf32> -> vector<8x8xf32>
    %cst_29 = arith.constant dense<0xFF800000> : vector<8xf32>
    %83 = vector.multi_reduction <maximumf>, %82, %cst_29 [1] : vector<8x8xf32> to vector<8xf32>
    %84 = vector.shape_cast %83 : vector<8xf32> to vector<8x1xf32>
    %85 = vector.broadcast %84 : vector<8x1xf32> to vector<8x8xf32>
    %86 = arith.subf %82, %85 : vector<8x8xf32>
    %87 = math.exp %86 : vector<8x8xf32>
    %cst_30 = arith.constant dense<0.000000e+00> : vector<8xf32>
    %88 = vector.multi_reduction <add>, %87, %cst_30 [1] : vector<8x8xf32> to vector<8xf32>
    %89 = vector.shape_cast %88 : vector<8xf32> to vector<8x1xf32>
    %90 = tpu.reciprocal %89 {approx = true} : vector<8x1xf32> -> vector<8x1xf32>
    %91 = vector.broadcast %90 : vector<8x1xf32> to vector<8x8xf32>
    %92 = arith.mulf %87, %91 : vector<8x8xf32>
    %93 = arith.truncf %92 : vector<8x8xf32> to vector<8x8xbf16>
    %cst_31 = arith.constant dense<0.000000e+00> : vector<8x128xf32>
    %94 = tpu.matmul %93, %4, %cst_31 {dimension_numbers = #tpu.dot_dimension_numbers<[1], [0], [0], [1], [0, 0, 1, 1], [], []>} : vector<8x8xbf16>, vector<8x128xbf16>, vector<8x128xf32> -> vector<8x128xf32>
    %c0_32 = arith.constant 0 : index
    %c2432 = arith.constant 2432 : index
    %95 = vector.load %arg3[%c0_32, %c2432] : memref<128x3328xbf16, #tpu.memory_space<vmem>>, vector<128x128xbf16>
    %96 = arith.truncf %94 : vector<8x128xf32> to vector<8x128xbf16>
    %cst_33 = arith.constant dense<0.000000e+00> : vector<8x128xf32>
    %97 = tpu.matmul %96, %95, %cst_33 {dimension_numbers = #tpu.dot_dimension_numbers<[1], [0], [0], [1], [0, 0, 1, 1], [], []>} : vector<8x128xbf16>, vector<128x128xbf16>, vector<8x128xf32> -> vector<8x128xf32>
    %98 = arith.addf %77, %97 : vector<8x128xf32>
    %99 = arith.addf %1, %98 : vector<8x128xf32>
    %100 = arith.truncf %99 : vector<8x128xf32> to vector<8x128xbf16>
    %c0_34 = arith.constant 0 : index
    %c1024 = arith.constant 1024 : index
    %101 = vector.load %arg3[%c0_34, %c1024] : memref<128x3328xbf16, #tpu.memory_space<vmem>>, vector<128x512xbf16>
    %cst_35 = arith.constant dense<0.000000e+00> : vector<8x512xf32>
    %102 = tpu.matmul %100, %101, %cst_35 {dimension_numbers = #tpu.dot_dimension_numbers<[1], [0], [0], [1], [0, 0, 1, 1], [], []>} : vector<8x128xbf16>, vector<128x512xbf16>, vector<8x512xf32> -> vector<8x512xf32>
    %c1 = arith.constant 1 : index
    %c0_36 = arith.constant 0 : index
    %103 = vector.load %arg4[%c1, %c0_36] : memref<12x1024xf32, #tpu.memory_space<vmem>>, vector<1x512xf32>
    %104 = vector.broadcast %103 : vector<1x512xf32> to vector<8x512xf32>
    %105 = arith.addf %102, %104 : vector<8x512xf32>
    %c0_37 = arith.constant 0 : index
    %c1536 = arith.constant 1536 : index
    %106 = vector.load %arg3[%c0_37, %c1536] : memref<128x3328xbf16, #tpu.memory_space<vmem>>, vector<128x512xbf16>
    %cst_38 = arith.constant dense<0.000000e+00> : vector<16x512xf32>
    %107 = tpu.matmul %5, %106, %cst_38 {dimension_numbers = #tpu.dot_dimension_numbers<[1], [0], [0], [1], [0, 0, 1, 1], [], []>} : vector<16x128xbf16>, vector<128x512xbf16>, vector<16x512xf32> -> vector<16x512xf32>
    %c2 = arith.constant 2 : index
    %c0_39 = arith.constant 0 : index
    %108 = vector.load %arg4[%c2, %c0_39] : memref<12x1024xf32, #tpu.memory_space<vmem>>, vector<1x512xf32>
    %109 = vector.broadcast %108 : vector<1x512xf32> to vector<16x512xf32>
    %110 = arith.addf %107, %109 : vector<16x512xf32>
    %c4 = arith.constant 4 : index
    %c0_40 = arith.constant 0 : index
    %111 = vector.load %arg4[%c4, %c0_40] : memref<12x1024xf32, #tpu.memory_space<vmem>>, vector<1x128xf32>
    %112 = vector.extract_strided_slice %105 {offsets = [0, 0], sizes = [8, 128], strides = [1, 1]} : vector<8x512xf32> to vector<8x128xf32>
    %113 = arith.truncf %112 : vector<8x128xf32> to vector<8x128xbf16>
    %114 = vector.extract_strided_slice %110 {offsets = [0, 0], sizes = [16, 128], strides = [1, 1]} : vector<16x512xf32> to vector<16x128xf32>
    %115 = arith.truncf %114 : vector<16x128xf32> to vector<16x128xbf16>
    %cst_41 = arith.constant dense<0.000000e+00> : vector<8x16xf32>
    %116 = tpu.matmul %113, %115, %cst_41 {dimension_numbers = #tpu.dot_dimension_numbers<[1], [1], [0], [0], [0, 0, 1, 0], [], []>} : vector<8x128xbf16>, vector<16x128xbf16>, vector<8x16xf32> -> vector<8x16xf32>
    %cst_42 = arith.constant dense<0xFF800000> : vector<8xf32>
    %117 = vector.multi_reduction <maximumf>, %116, %cst_42 [1] : vector<8x16xf32> to vector<8xf32>
    %118 = vector.shape_cast %117 : vector<8xf32> to vector<8x1xf32>
    %119 = vector.broadcast %118 : vector<8x1xf32> to vector<8x16xf32>
    %120 = arith.subf %116, %119 : vector<8x16xf32>
    %121 = math.exp %120 : vector<8x16xf32>
    %cst_43 = arith.constant dense<0.000000e+00> : vector<8xf32>
    %122 = vector.multi_reduction <add>, %121, %cst_43 [1] : vector<8x16xf32> to vector<8xf32>
    %123 = vector.shape_cast %122 : vector<8xf32> to vector<8x1xf32>
    %124 = tpu.reciprocal %123 {approx = true} : vector<8x1xf32> -> vector<8x1xf32>
    %125 = vector.broadcast %124 : vector<8x1xf32> to vector<8x16xf32>
    %126 = arith.mulf %121, %125 : vector<8x16xf32>
    %127 = arith.truncf %126 : vector<8x16xf32> to vector<8x16xbf16>
    %cst_44 = arith.constant dense<0.000000e+00> : vector<8x128xf32>
    %128 = tpu.matmul %127, %5, %cst_44 {dimension_numbers = #tpu.dot_dimension_numbers<[1], [0], [0], [1], [0, 0, 1, 1], [], []>} : vector<8x16xbf16>, vector<16x128xbf16>, vector<8x128xf32> -> vector<8x128xf32>
    %c0_45 = arith.constant 0 : index
    %c2560 = arith.constant 2560 : index
    %129 = vector.load %arg3[%c0_45, %c2560] : memref<128x3328xbf16, #tpu.memory_space<vmem>>, vector<128x128xbf16>
    %130 = arith.truncf %128 : vector<8x128xf32> to vector<8x128xbf16>
    %cst_46 = arith.constant dense<0.000000e+00> : vector<8x128xf32>
    %131 = tpu.matmul %130, %129, %cst_46 {dimension_numbers = #tpu.dot_dimension_numbers<[1], [0], [0], [1], [0, 0, 1, 1], [], []>} : vector<8x128xbf16>, vector<128x128xbf16>, vector<8x128xf32> -> vector<8x128xf32>
    %132 = vector.broadcast %111 : vector<1x128xf32> to vector<8x128xf32>
    %133 = arith.addf %132, %131 : vector<8x128xf32>
    %134 = vector.extract_strided_slice %105 {offsets = [0, 128], sizes = [8, 128], strides = [1, 1]} : vector<8x512xf32> to vector<8x128xf32>
    %135 = arith.truncf %134 : vector<8x128xf32> to vector<8x128xbf16>
    %136 = vector.extract_strided_slice %110 {offsets = [0, 128], sizes = [16, 128], strides = [1, 1]} : vector<16x512xf32> to vector<16x128xf32>
    %137 = arith.truncf %136 : vector<16x128xf32> to vector<16x128xbf16>
    %cst_47 = arith.constant dense<0.000000e+00> : vector<8x16xf32>
    %138 = tpu.matmul %135, %137, %cst_47 {dimension_numbers = #tpu.dot_dimension_numbers<[1], [1], [0], [0], [0, 0, 1, 0], [], []>} : vector<8x128xbf16>, vector<16x128xbf16>, vector<8x16xf32> -> vector<8x16xf32>
    %cst_48 = arith.constant dense<0xFF800000> : vector<8xf32>
    %139 = vector.multi_reduction <maximumf>, %138, %cst_48 [1] : vector<8x16xf32> to vector<8xf32>
    %140 = vector.shape_cast %139 : vector<8xf32> to vector<8x1xf32>
    %141 = vector.broadcast %140 : vector<8x1xf32> to vector<8x16xf32>
    %142 = arith.subf %138, %141 : vector<8x16xf32>
    %143 = math.exp %142 : vector<8x16xf32>
    %cst_49 = arith.constant dense<0.000000e+00> : vector<8xf32>
    %144 = vector.multi_reduction <add>, %143, %cst_49 [1] : vector<8x16xf32> to vector<8xf32>
    %145 = vector.shape_cast %144 : vector<8xf32> to vector<8x1xf32>
    %146 = tpu.reciprocal %145 {approx = true} : vector<8x1xf32> -> vector<8x1xf32>
    %147 = vector.broadcast %146 : vector<8x1xf32> to vector<8x16xf32>
    %148 = arith.mulf %143, %147 : vector<8x16xf32>
    %149 = arith.truncf %148 : vector<8x16xf32> to vector<8x16xbf16>
    %cst_50 = arith.constant dense<0.000000e+00> : vector<8x128xf32>
    %150 = tpu.matmul %149, %5, %cst_50 {dimension_numbers = #tpu.dot_dimension_numbers<[1], [0], [0], [1], [0, 0, 1, 1], [], []>} : vector<8x16xbf16>, vector<16x128xbf16>, vector<8x128xf32> -> vector<8x128xf32>
    %c0_51 = arith.constant 0 : index
    %c2688 = arith.constant 2688 : index
    %151 = vector.load %arg3[%c0_51, %c2688] : memref<128x3328xbf16, #tpu.memory_space<vmem>>, vector<128x128xbf16>
    %152 = arith.truncf %150 : vector<8x128xf32> to vector<8x128xbf16>
    %cst_52 = arith.constant dense<0.000000e+00> : vector<8x128xf32>
    %153 = tpu.matmul %152, %151, %cst_52 {dimension_numbers = #tpu.dot_dimension_numbers<[1], [0], [0], [1], [0, 0, 1, 1], [], []>} : vector<8x128xbf16>, vector<128x128xbf16>, vector<8x128xf32> -> vector<8x128xf32>
    %154 = arith.addf %133, %153 : vector<8x128xf32>
    %155 = vector.extract_strided_slice %105 {offsets = [0, 256], sizes = [8, 128], strides = [1, 1]} : vector<8x512xf32> to vector<8x128xf32>
    %156 = arith.truncf %155 : vector<8x128xf32> to vector<8x128xbf16>
    %157 = vector.extract_strided_slice %110 {offsets = [0, 256], sizes = [16, 128], strides = [1, 1]} : vector<16x512xf32> to vector<16x128xf32>
    %158 = arith.truncf %157 : vector<16x128xf32> to vector<16x128xbf16>
    %cst_53 = arith.constant dense<0.000000e+00> : vector<8x16xf32>
    %159 = tpu.matmul %156, %158, %cst_53 {dimension_numbers = #tpu.dot_dimension_numbers<[1], [1], [0], [0], [0, 0, 1, 0], [], []>} : vector<8x128xbf16>, vector<16x128xbf16>, vector<8x16xf32> -> vector<8x16xf32>
    %cst_54 = arith.constant dense<0xFF800000> : vector<8xf32>
    %160 = vector.multi_reduction <maximumf>, %159, %cst_54 [1] : vector<8x16xf32> to vector<8xf32>
    %161 = vector.shape_cast %160 : vector<8xf32> to vector<8x1xf32>
    %162 = vector.broadcast %161 : vector<8x1xf32> to vector<8x16xf32>
    %163 = arith.subf %159, %162 : vector<8x16xf32>
    %164 = math.exp %163 : vector<8x16xf32>
    %cst_55 = arith.constant dense<0.000000e+00> : vector<8xf32>
    %165 = vector.multi_reduction <add>, %164, %cst_55 [1] : vector<8x16xf32> to vector<8xf32>
    %166 = vector.shape_cast %165 : vector<8xf32> to vector<8x1xf32>
    %167 = tpu.reciprocal %166 {approx = true} : vector<8x1xf32> -> vector<8x1xf32>
    %168 = vector.broadcast %167 : vector<8x1xf32> to vector<8x16xf32>
    %169 = arith.mulf %164, %168 : vector<8x16xf32>
    %170 = arith.truncf %169 : vector<8x16xf32> to vector<8x16xbf16>
    %cst_56 = arith.constant dense<0.000000e+00> : vector<8x128xf32>
    %171 = tpu.matmul %170, %5, %cst_56 {dimension_numbers = #tpu.dot_dimension_numbers<[1], [0], [0], [1], [0, 0, 1, 1], [], []>} : vector<8x16xbf16>, vector<16x128xbf16>, vector<8x128xf32> -> vector<8x128xf32>
    %c0_57 = arith.constant 0 : index
    %c2816 = arith.constant 2816 : index
    %172 = vector.load %arg3[%c0_57, %c2816] : memref<128x3328xbf16, #tpu.memory_space<vmem>>, vector<128x128xbf16>
    %173 = arith.truncf %171 : vector<8x128xf32> to vector<8x128xbf16>
    %cst_58 = arith.constant dense<0.000000e+00> : vector<8x128xf32>
    %174 = tpu.matmul %173, %172, %cst_58 {dimension_numbers = #tpu.dot_dimension_numbers<[1], [0], [0], [1], [0, 0, 1, 1], [], []>} : vector<8x128xbf16>, vector<128x128xbf16>, vector<8x128xf32> -> vector<8x128xf32>
    %175 = arith.addf %154, %174 : vector<8x128xf32>
    %176 = vector.extract_strided_slice %105 {offsets = [0, 384], sizes = [8, 128], strides = [1, 1]} : vector<8x512xf32> to vector<8x128xf32>
    %177 = arith.truncf %176 : vector<8x128xf32> to vector<8x128xbf16>
    %178 = vector.extract_strided_slice %110 {offsets = [0, 384], sizes = [16, 128], strides = [1, 1]} : vector<16x512xf32> to vector<16x128xf32>
    %179 = arith.truncf %178 : vector<16x128xf32> to vector<16x128xbf16>
    %cst_59 = arith.constant dense<0.000000e+00> : vector<8x16xf32>
    %180 = tpu.matmul %177, %179, %cst_59 {dimension_numbers = #tpu.dot_dimension_numbers<[1], [1], [0], [0], [0, 0, 1, 0], [], []>} : vector<8x128xbf16>, vector<16x128xbf16>, vector<8x16xf32> -> vector<8x16xf32>
    %cst_60 = arith.constant dense<0xFF800000> : vector<8xf32>
    %181 = vector.multi_reduction <maximumf>, %180, %cst_60 [1] : vector<8x16xf32> to vector<8xf32>
    %182 = vector.shape_cast %181 : vector<8xf32> to vector<8x1xf32>
    %183 = vector.broadcast %182 : vector<8x1xf32> to vector<8x16xf32>
    %184 = arith.subf %180, %183 : vector<8x16xf32>
    %185 = math.exp %184 : vector<8x16xf32>
    %cst_61 = arith.constant dense<0.000000e+00> : vector<8xf32>
    %186 = vector.multi_reduction <add>, %185, %cst_61 [1] : vector<8x16xf32> to vector<8xf32>
    %187 = vector.shape_cast %186 : vector<8xf32> to vector<8x1xf32>
    %188 = tpu.reciprocal %187 {approx = true} : vector<8x1xf32> -> vector<8x1xf32>
    %189 = vector.broadcast %188 : vector<8x1xf32> to vector<8x16xf32>
    %190 = arith.mulf %185, %189 : vector<8x16xf32>
    %191 = arith.truncf %190 : vector<8x16xf32> to vector<8x16xbf16>
    %cst_62 = arith.constant dense<0.000000e+00> : vector<8x128xf32>
    %192 = tpu.matmul %191, %5, %cst_62 {dimension_numbers = #tpu.dot_dimension_numbers<[1], [0], [0], [1], [0, 0, 1, 1], [], []>} : vector<8x16xbf16>, vector<16x128xbf16>, vector<8x128xf32> -> vector<8x128xf32>
    %c0_63 = arith.constant 0 : index
    %c2944 = arith.constant 2944 : index
    %193 = vector.load %arg3[%c0_63, %c2944] : memref<128x3328xbf16, #tpu.memory_space<vmem>>, vector<128x128xbf16>
    %194 = arith.truncf %192 : vector<8x128xf32> to vector<8x128xbf16>
    %cst_64 = arith.constant dense<0.000000e+00> : vector<8x128xf32>
    %195 = tpu.matmul %194, %193, %cst_64 {dimension_numbers = #tpu.dot_dimension_numbers<[1], [0], [0], [1], [0, 0, 1, 1], [], []>} : vector<8x128xbf16>, vector<128x128xbf16>, vector<8x128xf32> -> vector<8x128xf32>
    %196 = arith.addf %175, %195 : vector<8x128xf32>
    %197 = arith.addf %99, %196 : vector<8x128xf32>
    %c11 = arith.constant 11 : index
    %c0_65 = arith.constant 0 : index
    %198 = vector.load %arg4[%c11, %c0_65] : memref<12x1024xf32, #tpu.memory_space<vmem>>, vector<1x128xf32>
    %c5 = arith.constant 5 : index
    %c0_66 = arith.constant 0 : index
    %199 = vector.load %arg4[%c5, %c0_66] : memref<12x1024xf32, #tpu.memory_space<vmem>>, vector<1x128xf32>
    %c6 = arith.constant 6 : index
    %c0_67 = arith.constant 0 : index
    %200 = vector.load %arg4[%c6, %c0_67] : memref<12x1024xf32, #tpu.memory_space<vmem>>, vector<1x128xf32>
    %cst_68 = arith.constant dense<0.000000e+00> : vector<8xf32>
    %201 = vector.multi_reduction <add>, %197, %cst_68 [1] : vector<8x128xf32> to vector<8xf32>
    %202 = vector.shape_cast %201 : vector<8xf32> to vector<8x1xf32>
    %cst_69 = arith.constant 3.125000e-02 : f32
    %203 = vector.broadcast %cst_69 : f32 to vector<8x1xf32>
    %204 = arith.mulf %202, %203 : vector<8x1xf32>
    %205 = vector.broadcast %204 : vector<8x1xf32> to vector<8x128xf32>
    %206 = arith.subf %197, %205 : vector<8x128xf32>
    %207 = vector.broadcast %198 : vector<1x128xf32> to vector<8x128xf32>
    %208 = arith.mulf %206, %207 : vector<8x128xf32>
    %209 = arith.mulf %208, %208 : vector<8x128xf32>
    %cst_70 = arith.constant dense<0.000000e+00> : vector<8xf32>
    %210 = vector.multi_reduction <add>, %209, %cst_70 [1] : vector<8x128xf32> to vector<8xf32>
    %211 = vector.shape_cast %210 : vector<8xf32> to vector<8x1xf32>
    %cst_71 = arith.constant 3.125000e-02 : f32
    %212 = vector.broadcast %cst_71 : f32 to vector<8x1xf32>
    %213 = arith.mulf %211, %212 : vector<8x1xf32>
    %cst_72 = arith.constant 9.99999974E-6 : f32
    %214 = vector.broadcast %cst_72 : f32 to vector<8x1xf32>
    %215 = arith.addf %213, %214 : vector<8x1xf32>
    %216 = math.rsqrt %215 : vector<8x1xf32>
    %217 = vector.broadcast %216 : vector<8x1xf32> to vector<8x128xf32>
    %218 = arith.mulf %208, %217 : vector<8x128xf32>
    %219 = vector.broadcast %199 : vector<1x128xf32> to vector<8x128xf32>
    %220 = arith.mulf %218, %219 : vector<8x128xf32>
    %221 = vector.broadcast %200 : vector<1x128xf32> to vector<8x128xf32>
    %222 = arith.addf %220, %221 : vector<8x128xf32>
    %223 = arith.truncf %222 : vector<8x128xf32> to vector<8x128xbf16>
    %c0_73 = arith.constant 0 : index
    %c3072 = arith.constant 3072 : index
    %224 = vector.load %arg3[%c0_73, %c3072] : memref<128x3328xbf16, #tpu.memory_space<vmem>>, vector<128x128xbf16>
    %cst_74 = arith.constant dense<0.000000e+00> : vector<8x128xf32>
    %225 = tpu.matmul %223, %224, %cst_74 {dimension_numbers = #tpu.dot_dimension_numbers<[1], [0], [0], [1], [0, 0, 1, 1], [], []>} : vector<8x128xbf16>, vector<128x128xbf16>, vector<8x128xf32> -> vector<8x128xf32>
    %c7 = arith.constant 7 : index
    %c0_75 = arith.constant 0 : index
    %226 = vector.load %arg4[%c7, %c0_75] : memref<12x1024xf32, #tpu.memory_space<vmem>>, vector<1x128xf32>
    %227 = vector.broadcast %226 : vector<1x128xf32> to vector<8x128xf32>
    %228 = arith.addf %225, %227 : vector<8x128xf32>
    %cst_76 = arith.constant 0.000000e+00 : f32
    %229 = vector.broadcast %cst_76 : f32 to vector<8x128xf32>
    %230 = arith.maximumf %228, %229 : vector<8x128xf32>
    %231 = arith.truncf %230 : vector<8x128xf32> to vector<8x128xbf16>
    %c0_77 = arith.constant 0 : index
    %c3200 = arith.constant 3200 : index
    %232 = vector.load %arg3[%c0_77, %c3200] : memref<128x3328xbf16, #tpu.memory_space<vmem>>, vector<128x128xbf16>
    %cst_78 = arith.constant dense<0.000000e+00> : vector<8x128xf32>
    %233 = tpu.matmul %231, %232, %cst_78 {dimension_numbers = #tpu.dot_dimension_numbers<[1], [0], [0], [1], [0, 0, 1, 1], [], []>} : vector<8x128xbf16>, vector<128x128xbf16>, vector<8x128xf32> -> vector<8x128xf32>
    %c8 = arith.constant 8 : index
    %c0_79 = arith.constant 0 : index
    %234 = vector.load %arg4[%c8, %c0_79] : memref<12x1024xf32, #tpu.memory_space<vmem>>, vector<1x128xf32>
    %235 = vector.broadcast %234 : vector<1x128xf32> to vector<8x128xf32>
    %236 = arith.addf %233, %235 : vector<8x128xf32>
    %237 = arith.addf %197, %236 : vector<8x128xf32>
    %c9 = arith.constant 9 : index
    %c0_80 = arith.constant 0 : index
    %238 = vector.load %arg4[%c9, %c0_80] : memref<12x1024xf32, #tpu.memory_space<vmem>>, vector<1x128xf32>
    %c10 = arith.constant 10 : index
    %c0_81 = arith.constant 0 : index
    %239 = vector.load %arg4[%c10, %c0_81] : memref<12x1024xf32, #tpu.memory_space<vmem>>, vector<1x128xf32>
    %cst_82 = arith.constant dense<0.000000e+00> : vector<8xf32>
    %240 = vector.multi_reduction <add>, %237, %cst_82 [1] : vector<8x128xf32> to vector<8xf32>
    %241 = vector.shape_cast %240 : vector<8xf32> to vector<8x1xf32>
    %cst_83 = arith.constant 3.125000e-02 : f32
    %242 = vector.broadcast %cst_83 : f32 to vector<8x1xf32>
    %243 = arith.mulf %241, %242 : vector<8x1xf32>
    %244 = vector.broadcast %243 : vector<8x1xf32> to vector<8x128xf32>
    %245 = arith.subf %237, %244 : vector<8x128xf32>
    %246 = vector.broadcast %198 : vector<1x128xf32> to vector<8x128xf32>
    %247 = arith.mulf %245, %246 : vector<8x128xf32>
    %248 = arith.mulf %247, %247 : vector<8x128xf32>
    %cst_84 = arith.constant dense<0.000000e+00> : vector<8xf32>
    %249 = vector.multi_reduction <add>, %248, %cst_84 [1] : vector<8x128xf32> to vector<8xf32>
    %250 = vector.shape_cast %249 : vector<8xf32> to vector<8x1xf32>
    %cst_85 = arith.constant 3.125000e-02 : f32
    %251 = vector.broadcast %cst_85 : f32 to vector<8x1xf32>
    %252 = arith.mulf %250, %251 : vector<8x1xf32>
    %cst_86 = arith.constant 9.99999974E-6 : f32
    %253 = vector.broadcast %cst_86 : f32 to vector<8x1xf32>
    %254 = arith.addf %252, %253 : vector<8x1xf32>
    %255 = math.rsqrt %254 : vector<8x1xf32>
    %256 = vector.broadcast %255 : vector<8x1xf32> to vector<8x128xf32>
    %257 = arith.mulf %247, %256 : vector<8x128xf32>
    %258 = vector.broadcast %238 : vector<1x128xf32> to vector<8x128xf32>
    %259 = arith.mulf %257, %258 : vector<8x128xf32>
    %260 = vector.broadcast %239 : vector<1x128xf32> to vector<8x128xf32>
    %261 = arith.addf %259, %260 : vector<8x128xf32>
    %c0_87 = arith.constant 0 : index
    %c0_88 = arith.constant 0 : index
    %c0_89 = arith.constant 0 : index
    %262 = vector.load %arg5[%c0_87, %c0_88, %c0_89] : memref<1x8x128xf32, #tpu.memory_space<vmem>>, vector<1x8x128xf32>
    %263 = vector.shape_cast %262 : vector<1x8x128xf32> to vector<8x128xf32>
    %264 = vector.shape_cast %261 : vector<8x128xf32> to vector<1x8x128xf32>
    tpu.vector_store %arg5[%c0_87, %c0_88, %c0_89], %264 {strides = array<i32>} : memref<1x8x128xf32, #tpu.memory_space<vmem>>, vector<1x8x128xf32>,
    return
  }
  func.func @transform_0(%arg0: i32) -> (i32, i32, i32) {
    %c0_i32 = arith.constant 0 : i32
    %c0_i32_0 = arith.constant 0 : i32
    %c0_i32_1 = arith.constant 0 : i32
    return %arg0, %c0_i32, %c0_i32_0 : i32, i32, i32
  }
  func.func @transform_1(%arg0: i32) -> (i32, i32, i32) {
    %c0_i32 = arith.constant 0 : i32
    %c0_i32_0 = arith.constant 0 : i32
    %c0_i32_1 = arith.constant 0 : i32
    return %arg0, %c0_i32, %c0_i32_0 : i32, i32, i32
  }
  func.func @transform_2(%arg0: i32) -> (i32, i32) {
    %c0_i32 = arith.constant 0 : i32
    %c0_i32_0 = arith.constant 0 : i32
    %c0_i32_1 = arith.constant 0 : i32
    return %c0_i32, %c0_i32_0 : i32, i32
  }
  func.func @transform_3(%arg0: i32) -> (i32, i32) {
    %c0_i32 = arith.constant 0 : i32
    %c0_i32_0 = arith.constant 0 : i32
    %c0_i32_1 = arith.constant 0 : i32
    return %c0_i32, %c0_i32_0 : i32, i32
  }
  func.func @transform_4(%arg0: i32) -> (i32, i32, i32) {
    %c0_i32 = arith.constant 0 : i32
    %c0_i32_0 = arith.constant 0 : i32
    %c0_i32_1 = arith.constant 0 : i32
    return %arg0, %c0_i32, %c0_i32_0 : i32, i32, i32
  }
}

</mosaic_0001>

<bundles_post_ra>
// kernel: tpu_custom_call.1
= control target key start
LH: loop header
LB: loop body
LE: loop exit
PB: predicated region body
PF: predicated region fallthrough
CT: control target
= control target key end

     0   :  { %9 = vsyncpa [#allocation3], 0  ;;  %s5365_s0 = inlined_call_operand.hbm [shape: f32[2,8,128], index: 0, kind: input, shape index: {}]   ;;  %s5366_s1 = inlined_call_operand.hbm [shape: f32[2,16,128], index: 1, kind: input, shape index: {}]   ;;  %s5367_s2 = inlined_call_operand.hbm [shape: bf16[128,3328], index: 2, kind: input, shape index: {}]   ;;  %s5368_s3 = inlined_call_operand.hbm [shape: f32[12,1024], index: 3, kind: input, shape index: {}]   ;;  %s5369_s4 = inlined_call_operand.hbm [shape: f32[2,8,128], index: 4, kind: output, shape index: {}]  }
   0x1   :  { %11 = vsyncpa [#allocation3 + $0x1], 0 }
   0x2   :  { %12 = vsyncpa [#allocation6], 0 }
   0x3   :  { %14 = vsyncpa [#allocation6 + $0x1], 0 }
   0x4   :  { %15 = vsyncpa [#allocation9], 0 }
   0x5   :  { %16 = vsyncpa [#allocation4], 0 }
   0x6   :  { %18 = vsyncpa [#allocation4 + $0x1], 0  ;;  %s4767_s15 = smov 0   ;;  %s4769_s16 = smov 0  }
   0x7   :  { %s4771_s17 = smov 0   ;;  %s4773_s18 = smov 0  }
   0x8 LB: > { %s4788_s19 = sadd.s32 4294967295, %s4726_s18   ;;  %s3487_s20 = sadd.s32 4294967294, %s4726_s18   ;;  %s4726_s18 = sphi %s4773_s18, %s5391_s18   ;;  %s4722_s17 = sphi %s4771_s17, %s5390_s17   ;;  %s4718_s16 = sphi %s4769_s16, %s5389_s16   ;;  %s4714_s15 = sphi %s4767_s15, %s5388_s15  }
   0x9   : > { %p44_p0 = scmp.ne.s32.totalorder %s4718_s16, %s4714_s15  ;;  %p5370_p1 = scmp.eq.s32.totalorder %s4788_s19, 0 }
   0xa   : > { %p142_p3 = scmp.eq.s32.totalorder %s3487_s20, 1  ;;  %p3488_p5 = scmp.ge.s32.totalorder %s4726_s18, 1 }
   0xb   : > { %p4797_p4 = por %p5370_p1, %p44_p0  ;;  %p149_p7 = scmp.lt.s32.totalorder %s4726_s18, 3 }
   0xc   : > { %p4802_p6 = por %p142_p3, %p44_p0  ;;  %s4728_s24 = smov [#allocation7]  }
   0xd   : > { %s5373_s21 = scalar_select %p4797_p4, 1, 0 }
   0xe   : > { %s5374_s22 = scalar_select %p4802_p6, 1, 0 }
   0xf   : > { %p4807_p8 = pnand %p3488_p5, %p149_p7  ;;  %s161_s25 = sshll.u32 %s4728_s24, 4  ;;  %s4811_s25 = int_to_ptr.vmem [resolvable:$true] %s161_s25 }
  0x10   : > { %s4729_s27 = smov [#allocation8]   ;;  %s4532_s5 = scalar_lea.hbm %s5367_s2, 26624 }
  0x11   : > { %p4156_p9 = pneg %p4807_p8  ;;  %s174_s28 = sshll.u32 %s4729_s27, 4  ;;  %s4822_s28 = int_to_ptr.vmem [resolvable:$true] %s174_s28 }
  0x12   : > { %p4533_p12 = scmp.ne.s32.totalorder %s5367_s2, %s4532_s5  ;;  %p4539_p5 = scmp.lt.u32.totalorder %s4532_s5, %s5367_s2 }
  0x13   : > { %p4818_p11 = pnand %p4156_p9, %p5370_p1 }
  0x15   : > { %p4534_p13 = pneg %p4818_p11 }
  0x17   : > { %p4535_p0 = pnand %p4534_p13, %p4533_p12 }
  0x19   : > { %p4536_p3 = pneg %p4535_p0 }
  0x1b   : > { %p4541_p7 = pnand %p4539_p5, %p4536_p3 }
  0x1d   : > { %4544 = shalt.err (!%p4541_p7)
}
  0x1e   : > { %s4545_s10 = scalar_lea.vmem %s4811_s25, 26624  ;;  %p4553_p2 = scmp.lt.s32.totalorder %s4811_s25, %s4811_s25 }
  0x1f   : > { %p4546_p9 = scmp.ne.s32.totalorder %s4811_s25, %s4545_s10  ;;  %p4554_p12 = scmp.lt.s32.totalorder %s4545_s10, %s4545_s10 }
  0x21   : > { %p4548_p10 = pnand %p4546_p9, %p4534_p13  ;;  %p4555_p0 = por %p4554_p12, %p4553_p2 }
  0x23   : > { %p4549_p1 = pneg %p4548_p10 }
  0x25   : > { %p4556_p6 = pnand %p4555_p0, %p4549_p1 }
  0x27   : > { %4559 = shalt.err (!%p4556_p6)
}
  0x28   : > { %s4730_s11 = smov 1664   ;;  %s4731_s12 = smov 104  }
  0x29   : > { %4159 = dma.hbm_to_vmem [thread:$0]  (!%p4818_p11), %s5367_s2, 26624, %s4811_s25, [#allocation6], %s4730_s11, %s4730_s11, %s4731_s12  }
  0x2a   : > { %s4560_s27 = scalar_lea.hbm %s5368_s3, 2048 }
  0x2b   : > { %p4561_p2 = scmp.ne.s32.totalorder %s5368_s3, %s4560_s27  ;;  %p4567_p10 = scmp.lt.u32.totalorder %s4560_s27, %s5368_s3 }
  0x2d   : > { %p4563_p1 = pnand %p4561_p2, %p4534_p13 }
  0x2f   : > { %p4564_p6 = pneg %p4563_p1 }
  0x31   : > { %p4569_p3 = pnand %p4567_p10, %p4564_p6 }
  0x33   : > { %4572 = shalt.err (!%p4569_p3)
}
  0x34   : > { %s4573_s25 = scalar_lea.vmem %s4822_s28, 2048  ;;  %p4581_p12 = scmp.lt.s32.totalorder %s4822_s28, %s4822_s28 }
  0x35   : > { %p4574_p5 = scmp.ne.s32.totalorder %s4822_s28, %s4573_s25  ;;  %p4582_p0 = scmp.lt.s32.totalorder %s4573_s25, %s4573_s25 }
  0x37   : > { %p4576_p7 = pnand %p4574_p5, %p4534_p13  ;;  %p4583_p2 = por %p4582_p0, %p4581_p12 }
  0x39   : > { %p4577_p9 = pneg %p4576_p7 }
  0x3b   : > { %p4584_p1 = pnand %p4583_p2, %p4577_p9 }
  0x3d   : > { %4587 = shalt.err (!%p4584_p1)
}
  0x3e   : > { %s4732_s7 = smov 1024   ;;  %s4733_s8 = smov 64  }
  0x3f   : > { %4162 = dma.hbm_to_vmem [thread:$0]  (!%p4818_p11), %s5368_s3, 2048, %s4822_s28, [#allocation9], %s4732_s7, %s4732_s7, %s4733_s8  }
  0x40   : > { %s4877_s11 = sadd.s32 1, %s4726_s18   ;;  %s31_s13 = sadd.s32 1, %s4722_s17 }
  0x41   : > { %s28_s12 = ssub.s32 %s4726_s18, %s4877_s11  ;;  %p38_p6 = scmp.ne.s32.totalorder %s4722_s17, %s4718_s16 }
  0x42   : > { %p29_p13 = scmp.eq.s32.totalorder %s28_s12, 0  ;;  %p39_p10 = scmp.eq.s32.totalorder %s4726_s18, 0 }
  0x43   : > { %p5377_p5 = scmp.eq.s32.totalorder %s4788_s19, 1  ;;  %p4176_p9 = scmp.lt.s32.totalorder %s4726_s18, 2 }
  0x44   : > { %s4886_s14 = scalar_select %p29_p13, %s4722_s17, %s31_s13  }
  0x45   : > { %p40_p3 = por %p39_p10, %p38_p6  ;;  %p4890_p7 = por %p5377_p5, %p38_p6 }
  0x46   : > { %s4896_s26 = sand.u32 1, %s4722_s17   ;;  %s3493_s24 = sshll.u32 %s4726_s18, 7 }
  0x47   : > { %s5378_s20 = scalar_select %p4890_p7, 1, 0 }
  0x48   : > { %s3492_s28 = sshll.u32 %s4896_s26, 3  ;;  %s4903_s30 = scalar_lea.hbm %s5365_s0, %s3493_s24 }
  0x49   : > { %s192_s5 = scalar_lea.vmem [#allocation2], %s3492_s28  ;;  %p4907_p11 = pnand %p4176_p9, %p40_p3 }
  0x4a   : > { %s199_s6 = sshll.u32 %s192_s5, 4  ;;  %s3494_s7 = sshll.u32 %s4896_s26, 4  ;;  %s4905_s6 = int_to_ptr.vmem [resolvable:$true] %s199_s6 }
  0x4b   : > { %s206_s8 = sand.u32 1, %s4726_s18   ;;  %s189_s9 = scalar_lea.sflag [#allocation3], %s4896_s26 }
  0x4c   : > { %s4588_s10 = scalar_lea.hbm %s4903_s30, 128  ;;  %p4590_p0 = pneg %p4907_p11 }
  0x4d   : > { %p4589_p12 = scmp.ne.s32.totalorder %s4903_s30, %s4588_s10  ;;  %s4593_s28 = scalar_lea.hbm %s5365_s0, 256 }
  0x4e   : > { %p4594_p13 = scmp.lt.u32.totalorder %s4903_s30, %s5365_s0  ;;  %p4595_p6 = scmp.lt.u32.totalorder %s4593_s28, %s4588_s10 }
  0x4f   : > { %p4591_p2 = pnand %p4590_p0, %p4589_p12  ;;  %p4597_p3 = scmp.lt.u32.totalorder %s4588_s10, %s4903_s30 }
  0x50   : > { %p4596_p10 = por %p4595_p6, %p4594_p13 }
  0x51   : > { %p4592_p1 = pneg %p4591_p2 }
  0x52   : > { %p4598_p5 = por %p4597_p3, %p4596_p10 }
  0x54   : > { %p4599_p9 = pnand %p4598_p5, %p4592_p1 }
  0x56   : > { %4602 = shalt.err (!%p4599_p9)
}
  0x57   : > { %s4603_s29 = scalar_lea.vmem %s4905_s6, 128  ;;  %s4734_s5 = smov [#allocation2]  }
  0x58   : > { %p4604_p12 = scmp.ne.s32.totalorder %s4905_s6, %s4603_s29  ;;  %s4608_s12 = sshll.u32 %s4734_s5, 4  ;;  %s4609_s12 = int_to_ptr.vmem [resolvable:$false] %s4608_s12 }
  0x59   : > { %s4610_s13 = scalar_lea.vmem %s4609_s12, 256  ;;  %p4611_p4 = scmp.lt.s32.totalorder %s4905_s6, %s4609_s12 }
  0x5a   : > { %p4606_p2 = pnand %p4604_p12, %p4590_p0  ;;  %p4612_p13 = scmp.lt.s32.totalorder %s4610_s13, %s4603_s29 }
  0x5c   : > { %p4607_p7 = pneg %p4606_p2  ;;  %p4613_p6 = por %p4612_p13, %p4611_p4 }
  0x5e   : > { %p4614_p10 = pnand %p4613_p6, %p4607_p7 }
  0x60   : > { %4617 = shalt.err (!%p4614_p10)
}
  0x61   : > { %4166 = dma.hbm_to_vmem [thread:$0]  (!%p4907_p11), %s4903_s30, 128, %s4905_s6, %s189_s9  }
  0x62   : > { %s210_s10 = scalar_lea.vmem [#allocation5], %s3494_s7  ;;  %s3723_s24 = sshll.u32 %s4726_s18, 8 }
  0x63   : > { %s217_s28 = sshll.u32 %s210_s10, 4  ;;  %s4947_s5 = scalar_lea.hbm %s5366_s1, %s3723_s24  ;;  %s4941_s28 = int_to_ptr.vmem [resolvable:$true] %s217_s28 }
  0x64   : > { %s4951_s12 = scalar_lea.sflag [#allocation6], %s206_s8  ;;  %s4618_s13 = scalar_lea.hbm %s4947_s5, 256 }
  0x65   : > { %p4619_p4 = scmp.ne.s32.totalorder %s4947_s5, %s4618_s13  ;;  %s4623_s6 = scalar_lea.hbm %s5366_s1, 512 }
  0x66   : > { %p4624_p3 = scmp.lt.u32.totalorder %s4947_s5, %s5366_s1  ;;  %p4625_p5 = scmp.lt.u32.totalorder %s4623_s6, %s4618_s13 }
  0x67   : > { %p4621_p7 = pnand %p4619_p4, %p4590_p0  ;;  %p4627_p12 = scmp.lt.u32.totalorder %s4618_s13, %s4947_s5 }
  0x68   : > { %p4626_p9 = por %p4625_p5, %p4624_p3 }
  0x69   : > { %p4622_p1 = pneg %p4621_p7 }
  0x6a   : > { %p4628_p2 = por %p4627_p12, %p4626_p9 }
  0x6c   : > { %p4629_p13 = pnand %p4628_p2, %p4622_p1 }
  0x6e   : > { %4632 = shalt.err (!%p4629_p13)
}
  0x6f   : > { %s4633_s8 = scalar_lea.vmem %s4941_s28, 256  ;;  %s4735_s10 = smov [#allocation5]  }
  0x70   : > { %p4634_p6 = scmp.ne.s32.totalorder %s4941_s28, %s4633_s8  ;;  %s4638_s24 = sshll.u32 %s4735_s10, 4  ;;  %s4639_s24 = int_to_ptr.vmem [resolvable:$false] %s4638_s24 }
  0x71   : > { %s4640_s27 = scalar_lea.vmem %s4639_s24, 512  ;;  %p4641_p7 = scmp.lt.s32.totalorder %s4941_s28, %s4639_s24 }
  0x72   : > { %p4636_p10 = pnand %p4634_p6, %p4590_p0  ;;  %p4642_p3 = scmp.lt.s32.totalorder %s4640_s27, %s4633_s8 }
  0x74   : > { %p4637_p4 = pneg %p4636_p10  ;;  %p4643_p5 = por %p4642_p3, %p4641_p7 }
  0x76   : > { %p4644_p9 = pnand %p4643_p5, %p4637_p4 }
  0x78   : > { %4647 = shalt.err (!%p4644_p9)
}
  0x79   : > { %s4736_s29 = smov 128   ;;  %s4737_s13 = smov 8  }
  0x7a   : > { %4169 = dma.hbm_to_vmem [thread:$0]  (!%p4907_p11), %s4947_s5, 256, %s4941_s28, %s4951_s12, %s4736_s29, %s4736_s29, %s4737_s13  }
  0x7b   : > { %229 = sbr.rel (%p4807_p8) target bundleno = 5186 (0x1442), region = 36  ;;  %s4980_s26 = sand.u32 (!%p4807_p8), 1, %s4718_s16  }
  0x7c   : > { %s3498_s30 = sshll.u32 (!%p4807_p8), %s4980_s26, 3  ;;  %s232_s6 = scalar_lea.sflag (!%p4807_p8), [#allocation3], %s4980_s26 }
  0x7d   : > { %s4986_s7 = scalar_lea.vmem (!%p4807_p8), [#allocation2], %s3498_s30  ;;  %p5380_p0 = scmp.ne.s32.totalorder (!%p4807_p8), %s5373_s21, 0 }
  0x82   : > { %4693 = dma.done.wait (%p5380_p0), %s232_s6, 128  }
  0x83   : > { %4695 = vsyncadd (%p5380_p0), %s232_s6, 4294967168  ;;  %s240_s23 = sand.u32 1, %s4788_s19   ;;  %s3499_s25 = sshll.u32 %s4980_s26, 4 }
  0x84   : > { %s241_s28 = scalar_lea.sflag [#allocation6], %s240_s23  ;;  %s4994_s5 = scalar_lea.vmem [#allocation5], %s3499_s25 }
  0x85   : > { %4697 = dma.done.wait (%p5380_p0), %s241_s28, 256  }
  0x86   : > { %4699 = vsyncadd (%p5380_p0), %s241_s28, 4294967040  ;;  %p5381_p8 = scmp.eq.s32.totalorder %s4788_s19, 0 }
  0x88   : > { %4701 = dma.done.wait (%p5381_p8), [#allocation6], 26624   ;;  %p5382_p11 = pmov %p5381_p8 }
  0x89   : > { %p5383_p1 = pmov %p5381_p8 }
  0x8a   : > { %4703 = vsyncadd (%p5382_p11), [#allocation6], 4294940672 }
  0x8b   : > { %4705 = dma.done.wait (%p5383_p1), [#allocation9], 2048   ;;  %p5384_p12 = pmov %p5383_p1 }
  0x8c   : > { %v4738_v0 = vmov 0   ;;  %v4223_v1 = vld [vmem:[#allocation7 + $0x4] ss:$104 sps:$4 sm:$0xff]   ;;  %v4225_v2 = vld [vmem:[#allocation7] ss:$104 sps:$4 sm:$0xff]   ;;  %v283_v22 = vld [vmem:[%s4986_s7] sm:$0xff] }
  0x8d   : > { %4707 = vsyncadd (%p5384_p12), [#allocation9], 4294965248  ;;  %748 = vmatprep.mubr.bf16.mxu0 %v4738_v0  ;;  %789 = vmatprep.mubr.bf16.mxu1 %v4738_v0  ;;  %v4226_v3 = vld [vmem:[#allocation7 + $0xd4] ss:$104 sps:$4 sm:$0xff]   ;;  %v4228_v4 = vld [vmem:[#allocation7 + $0xd0] ss:$104 sps:$4 sm:$0xff]   ;;  %v5011_v25 = vpack.c.bf16 %v283_v22, %v283_v22 }
  0x8e   : > { %716 = vmatprep.subr.bf16.mxu0 %v4223_v1  ;;  %v4229_v5 = vld [vmem:[#allocation7 + $0x1a4] ss:$104 sps:$4 sm:$0xff]   ;;  %v4231_v6 = vld [vmem:[#allocation7 + $0x1a0] ss:$104 sps:$4 sm:$0xff]   ;;  %v4232_v7 = vld [vmem:[#allocation7 + $0x274] ss:$104 sps:$4 sm:$0xff]  }
  0x8f   : > { %717 = vmatpush1.bf16.msra.mxu0 %v4225_v2  ;;  %v4234_v8 = vld [vmem:[#allocation7 + $0x270] ss:$104 sps:$4 sm:$0xff]   ;;  %v4235_v9 = vld [vmem:[#allocation7 + $0x344] ss:$104 sps:$4 sm:$0xff]   ;;  %v4237_v10 = vld [vmem:[#allocation7 + $0x340] ss:$104 sps:$4 sm:$0xff]  }
  0x90   : > { %718 = vmatprep.subr.bf16.mxu0 %v4226_v3  ;;  %v4238_v11 = vld [vmem:[#allocation7 + $0x414] ss:$104 sps:$4 sm:$0xff]   ;;  %v4240_v12 = vld [vmem:[#allocation7 + $0x410] ss:$104 sps:$4 sm:$0xff]   ;;  %v4241_v13 = vld [vmem:[#allocation7 + $0x4e4] ss:$104 sps:$4 sm:$0xff]  }
  0x91   : > { %v4243_v14 = vld [vmem:[#allocation7 + $0x4e0] ss:$104 sps:$4 sm:$0xff]   ;;  %v4271_v15 = vld [vmem:[#allocation7 + $0xc] ss:$104 sps:$4 sm:$0xff]   ;;  %v4274_v17 = vld [vmem:[#allocation7 + $0xdc] ss:$104 sps:$4 sm:$0xff]  }
  0x92   : > { %v4273_v16 = vld [vmem:[#allocation7 + $0x8] ss:$104 sps:$4 sm:$0xff]   ;;  %v4244_v18 = vld [vmem:[#allocation7 + $0x5b4] ss:$104 sps:$4 sm:$0xff]   ;;  %757 = vmatprep.subr.bf16.mxu1 %v4271_v15  ;;  %v4276_v19 = vld [vmem:[#allocation7 + $0xd8] ss:$104 sps:$4 sm:$0xff]  }
  0x93   : > { %719 = vmatpush1.bf16.msra.mxu0 %v4228_v4  ;;  %758 = vmatpush1.bf16.msra.mxu1 %v4273_v16  ;;  %v4246_v20 = vld [vmem:[#allocation7 + $0x5b0] ss:$104 sps:$4 sm:$0xff]   ;;  %v4277_v21 = vld [vmem:[#allocation7 + $0x1ac] ss:$104 sps:$4 sm:$0xff]   ;;  %v4280_v26 = vld [vmem:[#allocation7 + $0x27c] ss:$104 sps:$4 sm:$0xff]  }
  0x94   : > { %720 = vmatprep.subr.bf16.mxu0 %v4229_v5  ;;  %759 = vmatprep.subr.bf16.mxu1 %v4274_v17  ;;  %v4249_v23 = vld [vmem:[#allocation7 + $0x14] ss:$104 sps:$4 sm:$0xff]   ;;  %v4279_v24 = vld [vmem:[#allocation7 + $0x1a8] ss:$104 sps:$4 sm:$0xff]   ;;  %v4252_v28 = vld [vmem:[#allocation7 + $0xe4] ss:$104 sps:$4 sm:$0xff]  }
  0x95   : > { %v4247_v27 = vld [vmem:[#allocation7 + $0x10] ss:$104 sps:$4 sm:$0xff]   ;;  %v4250_v30 = vld [vmem:[#allocation7 + $0xe0] ss:$104 sps:$4 sm:$0xff]   ;;  %v4283_v31 = vld [vmem:[#allocation7 + $0x34c] ss:$104 sps:$4 sm:$0xff]  }
  0x96   : > { %v4282_v29 = vld [vmem:[#allocation7 + $0x278] ss:$104 sps:$4 sm:$0xff]   ;;  %v4255_v32 = vld [vmem:[#allocation7 + $0x1b4] ss:$104 sps:$4 sm:$0xff]   ;;  %v4285_v33 = vld [vmem:[#allocation7 + $0x348] ss:$104 sps:$4 sm:$0xff]  }
  0x97   : > { %721 = vmatpush1.bf16.msra.mxu0 %v4231_v6  ;;  %760 = vmatpush1.bf16.msra.mxu1 %v4276_v19  ;;  %v4286_v34 = vld [vmem:[#allocation7 + $0x41c] ss:$104 sps:$4 sm:$0xff]   ;;  %v4253_v35 = vld [vmem:[#allocation7 + $0x1b0] ss:$104 sps:$4 sm:$0xff]   ;;  %v4289_v38 = vld [vmem:[#allocation7 + $0x4ec] ss:$104 sps:$4 sm:$0xff]  }
  0x98   : > { %722 = vmatprep.subr.bf16.mxu0 %v4232_v7  ;;  %761 = vmatprep.subr.bf16.mxu1 %v4277_v21  ;;  %v4258_v36 = vld [vmem:[#allocation7 + $0x284] ss:$104 sps:$4 sm:$0xff]   ;;  %v4288_v37 = vld [vmem:[#allocation7 + $0x418] ss:$104 sps:$4 sm:$0xff]   ;;  %v4261_v40 = vld [vmem:[#allocation7 + $0x354] ss:$104 sps:$4 sm:$0xff]  }
  0x99   : > { %v4256_v39 = vld [vmem:[#allocation7 + $0x280] ss:$104 sps:$4 sm:$0xff]   ;;  %v4292_v42 = vld [vmem:[#allocation7 + $0x5bc] ss:$104 sps:$4 sm:$0xff]   ;;  %v4259_v43 = vld [vmem:[#allocation7 + $0x350] ss:$104 sps:$4 sm:$0xff]  }
  0x9a   : > { %v4291_v41 = vld [vmem:[#allocation7 + $0x4e8] ss:$104 sps:$4 sm:$0xff]   ;;  %v4264_v44 = vld [vmem:[#allocation7 + $0x424] ss:$104 sps:$4 sm:$0xff]   ;;  %v4294_v45 = vld [vmem:[#allocation7 + $0x5b8] ss:$104 sps:$4 sm:$0xff]  }
  0x9b   : > { %723 = vmatpush1.bf16.msra.mxu0 %v4234_v8  ;;  %762 = vmatpush1.bf16.msra.mxu1 %v4279_v24  ;;  %v4262_v46 = vld [vmem:[#allocation7 + $0x420] ss:$104 sps:$4 sm:$0xff]   ;;  %v4267_v47 = vld [vmem:[#allocation7 + $0x4f4] ss:$104 sps:$4 sm:$0xff]   ;;  %v4265_v48 = vld [vmem:[#allocation7 + $0x4f0] ss:$104 sps:$4 sm:$0xff]  }
  0x9c   : > { %724 = vmatprep.subr.bf16.mxu0 %v4235_v9  ;;  %763 = vmatprep.subr.bf16.mxu1 %v4280_v26  ;;  %v4270_v49 = vld [vmem:[#allocation7 + $0x5c4] ss:$104 sps:$4 sm:$0xff]   ;;  %v4268_v50 = vld [vmem:[#allocation7 + $0x5c0] ss:$104 sps:$4 sm:$0xff]   ;;  %v4739_v4 = vmov 0.0   ;;  %vm4740_vm0 = vmmov 0   ;;  %v356_v9 = vlaneseq }
  0x9d   : > { %v4297_v51 = vld [vmem:[#allocation7 + $0x1c] ss:$104 sps:$4 sm:$0xff]   ;;  %v4295_v52 = vld [vmem:[#allocation7 + $0x18] ss:$104 sps:$4 sm:$0xff]   ;;  %v4300_v53 = vld [vmem:[#allocation7 + $0xec] ss:$104 sps:$4 sm:$0xff]  }
  0x9e   : > { %v4298_v54 = vld [vmem:[#allocation7 + $0xe8] ss:$104 sps:$4 sm:$0xff]   ;;  %v4303_v55 = vld [vmem:[#allocation7 + $0x1bc] ss:$104 sps:$4 sm:$0xff]   ;;  %v4301_v56 = vld [vmem:[#allocation7 + $0x1b8] ss:$104 sps:$4 sm:$0xff]  }
  0x9f   : > { %725 = vmatpush1.bf16.msra.mxu0 %v4237_v10  ;;  %764 = vmatpush1.bf16.msra.mxu1 %v4282_v29  ;;  %v4306_v57 = vld [vmem:[#allocation7 + $0x28c] ss:$104 sps:$4 sm:$0xff]   ;;  %v4304_v58 = vld [vmem:[#allocation7 + $0x288] ss:$104 sps:$4 sm:$0xff]   ;;  %v4309_v59 = vld [vmem:[#allocation7 + $0x35c] ss:$104 sps:$4 sm:$0xff]  }
  0xa0   : > { %726 = vmatprep.subr.bf16.mxu0 %v4238_v11  ;;  %765 = vmatprep.subr.bf16.mxu1 %v4283_v31  ;;  %v4307_v60 = vld [vmem:[#allocation7 + $0x358] ss:$104 sps:$4 sm:$0xff]   ;;  %v4312_v61 = vld [vmem:[#allocation7 + $0x42c] ss:$104 sps:$4 sm:$0xff]   ;;  %v4310_v62 = vld [vmem:[#allocation7 + $0x428] ss:$104 sps:$4 sm:$0xff]  }
  0xa1   : > { %v4315_v63 = vld [vmem:[#allocation7 + $0x4fc] ss:$104 sps:$4 sm:$0xff]   ;;  %v4313_v1 = vld [vmem:[#allocation7 + $0x4f8] ss:$104 sps:$4 sm:$0xff]   ;;  %v4318_v2 = vld [vmem:[#allocation7 + $0x5cc] ss:$104 sps:$4 sm:$0xff]  }
  0xa2   : > { %v4316_v3 = vld [vmem:[#allocation7 + $0x5c8] ss:$104 sps:$4 sm:$0xff]   ;;  %vm923_vm1 = vcmask 64512   ;;  %vm939_vm2 = vcmask 1043456   ;;  %vm2341_vm3 = vcmask 130048   ;;  %s3720_s21 = sshll.u32 %s4788_s19, 7 }
  0xa3   : > { %727 = vmatpush1.bf16.msra.mxu0 %v4240_v12  ;;  %766 = vmatpush1.bf16.msra.mxu1 %v4285_v33  ;;  %v352_v11 = vld [vmem:[#allocation8] ss:$8 sm:$0xf]  ;;  %v5027_v12 = vshrl.u32 %v356_v9, 7  ;;  %s281_s12 = scalar_lea.vmem [#allocation10], %s3498_s30  ;;  %s5321_s24 = scalar_lea.hbm %s5369_s4, %s3720_s21 }
  0xa4   : > { %728 = vmatprep.subr.bf16.mxu0 %v4241_v13  ;;  %767 = vmatprep.subr.bf16.mxu1 %v4286_v34  ;;  %s3375_s9 = sshll.u32 %s281_s12, 4  ;;  %s3362_s27 = scalar_lea.sflag [#allocation4], %s4980_s26  ;;  %s5323_s9 = int_to_ptr.vmem [resolvable:$true] %s3375_s9 }
  0xa5   : > { %v374_v16 = vsub.s32 4, %v5027_v12  ;;  %v5037_v21 = vsub.s32 0, %v5027_v12  ;;  %s4648_s29 = scalar_lea.vmem %s5323_s9, 128  ;;  %p5385_p13 = scmp.ne.s32.totalorder %s5378_s20, 0 }
  0xa6   : > { %p4649_p2 = scmp.ne.s32.totalorder %s5323_s9, %s4648_s29  ;;  %s4741_s19 = smov [#allocation10]  }
  0xa7   : > { %729 = vmatpush1.bf16.msra.mxu0 %v4243_v14  ;;  %768 = vmatpush1.bf16.msra.mxu1 %v4288_v37  ;;  %v353_v14 = vld [vmem:[#allocation8] ss:$8 sm:$0xf0]  ;;  %s4652_s13 = sshll.u32 %s4741_s19, 4  ;;  %s4653_s13 = int_to_ptr.vmem [resolvable:$false] %s4652_s13 }
  0xa8   : > { %730 = vmatprep.subr.bf16.mxu0 %v4244_v18  ;;  %769 = vmatprep.subr.bf16.mxu1 %v4289_v38  ;;  %v378_v18 = vsub.s32 5, %v5027_v12  ;;  %v5033_v19 = vor.u32 %v353_v14, %v352_v11  ;;  %v4321_v11 = vld [vmem:[#allocation7 + $0x44] ss:$104 sps:$4 sm:$0xff]   ;;  %p4650_p6 = pnand %p4649_p2, %p5385_p13  ;;  %s4654_s30 = scalar_lea.vmem %s4653_s13, 256 }
  0xa9   : > { %p4655_p4 = scmp.lt.s32.totalorder %s5323_s9, %s4653_s13  ;;  %p4656_p7 = scmp.lt.s32.totalorder %s4654_s30, %s4648_s29 }
  0xaa   : > { %v379_v22 = vrot.slane %v5033_v19, %v378_v18  ;;  %v4325_v18 = vld [vmem:[#allocation7 + $0x1e4] ss:$104 sps:$4 sm:$0xff]   ;;  %p4651_p10 = pneg %p4650_p6 }
  0xab   : > { %731 = vmatpush1.bf16.msra.mxu0 %v4246_v20  ;;  %770 = vmatpush1.bf16.msra.mxu1 %v4291_v41  ;;  %v375_v20 = vrot.slane %v5033_v19, %v374_v16  ;;  %v4323_v16 = vld [vmem:[#allocation7 + $0x114] ss:$104 sps:$4 sm:$0xff]   ;;  %p4657_p3 = por %p4656_p7, %p4655_p4 }
  0xac   : > { %798 = vmatprep.subr.bf16.mxu0 %v4249_v23  ;;  %771 = vmatprep.subr.bf16.mxu1 %v4292_v42  ;;  %v5041_v23 = vsub.s32 1, %v5027_v12 }
  0xad   : > { %p4658_p5 = pnand %p4657_p3, %p4651_p10 }
  0xae   : > { %749 = vmatmul.mubr.bf16.vlgmr.msra.gmra.mrb[0].mxu0 %v5011_v25  ;;  %v363_v31 = vrot.slane %v5033_v19, %v5041_v23 }
  0xaf   : > { %799 = vmatpush1.bf16.msra.mxu0 %v4247_v27  ;;  %830 = vmatprep.mubr.bf16.mxu0 %v4738_v0 }
  0xb0   : > { %800 = vmatprep.subr.bf16.mxu0 %v4252_v28  ;;  %772 = vmatpush1.bf16.msra.mxu1 %v4294_v45  ;;  %v359_v28 = vrot.slane %v5033_v19, %v5037_v21 }
  0xb1   : > { %839 = vmatprep.subr.bf16.mxu1 %v4297_v51 }
  0xb3   : > { %801 = vmatpush1.bf16.msra.mxu0 %v4250_v30  ;;  %790 = vmatmul.mubr.bf16.vlgmr.msra.gmra.mrb[0].mxu1 %v5011_v25 }
  0xb4   : > { %802 = vmatprep.subr.bf16.mxu0 %v4255_v32  ;;  %871 = vmatprep.mubr.bf16.mxu1 %v4738_v0 }
  0xb5   : > { %840 = vmatpush1.bf16.msra.mxu1 %v4295_v52 }
  0xb6   : > { %841 = vmatprep.subr.bf16.mxu1 %v4300_v53 }
  0xb7   : > { %803 = vmatpush1.bf16.msra.mxu0 %v4253_v35 }
  0xb8   : > { %804 = vmatprep.subr.bf16.mxu0 %v4258_v36 }
  0xb9   : > { %842 = vmatpush1.bf16.msra.mxu1 %v4298_v54 }
  0xba   : > { %843 = vmatprep.subr.bf16.mxu1 %v4303_v55 }
  0xbb   : > { %805 = vmatpush1.bf16.msra.mxu0 %v4256_v39 }
  0xbc   : > { %806 = vmatprep.subr.bf16.mxu0 %v4261_v40 }
  0xbd   : > { %844 = vmatpush1.bf16.msra.mxu1 %v4301_v56 }
  0xbe   : > { %845 = vmatprep.subr.bf16.mxu1 %v4306_v57 }
  0xbf   : > { %807 = vmatpush1.bf16.msra.mxu0 %v4259_v43 }
  0xc0   : > { %808 = vmatprep.subr.bf16.mxu0 %v4264_v44 }
  0xc1   : > { %846 = vmatpush1.bf16.msra.mxu1 %v4304_v58 }
  0xc2   : > { %847 = vmatprep.subr.bf16.mxu1 %v4309_v59 }
  0xc3   : > { %809 = vmatpush1.bf16.msra.mxu0 %v4262_v46 }
  0xc4   : > { %810 = vmatprep.subr.bf16.mxu0 %v4267_v47 }
  0xc5   : > { %848 = vmatpush1.bf16.msra.mxu1 %v4307_v60 }
  0xc6   : > { %849 = vmatprep.subr.bf16.mxu1 %v4312_v61 }
  0xc7   : > { %811 = vmatpush1.bf16.msra.mxu0 %v4265_v48 }
  0xc8   : > { %812 = vmatprep.subr.bf16.mxu0 %v4270_v49 }
  0xc9   : > { %850 = vmatpush1.bf16.msra.mxu1 %v4310_v62 }
  0xca   : > { %851 = vmatprep.subr.bf16.mxu1 %v4315_v63  ;;  %v5062_v63 = vsel %vm939_vm2, %v5011_v25, 0 }
  0xcb   : > { %813 = vmatpush1.bf16.msra.mxu0 %v4268_v50 }
  0xcc   : > { %3846 = vmatprep.subr.bf16.mxu0 %v4739_v4 }
  0xcd   : > { %852 = vmatpush1.bf16.msra.mxu1 %v4313_v1 }
  0xce   : > { %831 = vmatmul.mubr.bf16.vlgmr.msra.gmra.mrb[4].mxu0 %v5011_v25  ;;  %853 = vmatprep.subr.bf16.mxu1 %v4318_v2 }
  0xcf   : > { %3848 = vmatprep.mubr.msk.bf16.mxu0 %vm4740_vm0, %v4739_v4 }
  0xd1   : > { %854 = vmatpush1.bf16.msra.mxu1 %v4316_v3 }
  0xd2   : > { %3878 = vmatprep.subr.bf16.mxu1 %v4739_v4 }
  0xd4   : > { %872 = vmatmul.mubr.bf16.vlgmr.msra.gmra.mrb[4].mxu1 %v5011_v25  ;;  %v4320_v25 = vld [vmem:[#allocation7 + $0x110] ss:$104 sps:$4 sm:$0xff]  }
  0xd5   : > { %3880 = vmatprep.mubr.msk.bf16.mxu1 %vm4740_vm0, %v4739_v4 }
 0x181   : > { %v750_v5 = vpop.f32.mrb[0].mxu0 }
 0x182   : > { %v752_v6 = vpop.f32.mrb[1].mxu0  ;;  %v751_v35 = vadd.f32 %v750_v5, %v359_v28  ;;  %v4331_v28 = vld [vmem:[#allocation7 + $0x454] ss:$104 sps:$4 sm:$0xff]  }
 0x183   : > { %v754_v7 = vpop.f32.mrb[2].mxu0  ;;  %v753_v36 = vadd.f32 %v752_v6, %v363_v31  ;;  %v4319_v6 = vld [vmem:[#allocation7 + $0x40] ss:$104 sps:$4 sm:$0xff]   ;;  %v4334_v31 = vld [vmem:[#allocation7 + $0x5f4] ss:$104 sps:$4 sm:$0xff]  }
 0x184   : > { %v755_v8 = vpop.f32.mrb[3].mxu0  ;;  %v881_v37 = vpack.c.bf16 %v751_v35, %v751_v35  ;;  %v5094_v35 = vsub.s32 2, %v5027_v12 }
 0x185   : > { %v1089_v38 = vpack.c.bf16 %v753_v36, %v753_v36 }
 0x186   : > { %v5025_v10 = vpop.f32.mrb[0].mxu1 }
 0x187   : > { %v5029_v13 = vpop.f32.mrb[1].mxu1 }
 0x188   : > { %v795_v15 = vpop.f32.mrb[2].mxu1 }
 0x189   : > { %v796_v17 = vpop.f32.mrb[3].mxu1  ;;  %v4322_v15 = vld [vmem:[#allocation7 + $0x1e0] ss:$104 sps:$4 sm:$0xff]  }
 0x18a   : > { %v4324_v17 = vld [vmem:[#allocation7 + $0x2b0] ss:$104 sps:$4 sm:$0xff]  }
 0x1a1   : > { %v832_v24 = vpop.f32.mrb[4].mxu0 }
 0x1a2   : > { %v833_v26 = vadd.f32 %v832_v24, %v375_v20  ;;  %v834_v27 = vpop.f32.mrb[5].mxu0  ;;  %v4326_v20 = vld [vmem:[#allocation7 + $0x380] ss:$104 sps:$4 sm:$0xff]   ;;  %v4328_v24 = vld [vmem:[#allocation7 + $0x450] ss:$104 sps:$4 sm:$0xff]  }
 0x1a3   : > { %v835_v29 = vadd.f32 %v834_v27, %v379_v22  ;;  %v836_v30 = vpop.f32.mrb[6].mxu0  ;;  %v4327_v22 = vld [vmem:[#allocation7 + $0x2b4] ss:$104 sps:$4 sm:$0xff]   ;;  %v4330_v27 = vld [vmem:[#allocation7 + $0x520] ss:$104 sps:$4 sm:$0xff]  }
 0x1a4   : > { %v882_v32 = vpack.c.bf16 %v833_v26, %v833_v26  ;;  %v837_v33 = vpop.f32.mrb[7].mxu0  ;;  %v4329_v26 = vld [vmem:[#allocation7 + $0x384] ss:$104 sps:$4 sm:$0xff]  }
 0x1a5   : > { %v1090_v34 = vpack.c.bf16 %v835_v29, %v835_v29  ;;  %v4332_v29 = vld [vmem:[#allocation7 + $0x5f0] ss:$104 sps:$4 sm:$0xff]   ;;  %v4333_v30 = vld [vmem:[#allocation7 + $0x524] ss:$104 sps:$4 sm:$0xff]  }
 0x1a6   : > { %3847 = vmatpush3.bf16.xpose.msra.mxu0 %v882_v32  ;;  %v382_v32 = vsub.s32 6, %v5027_v12 }
 0x1a7   : > { %3879 = vmatpush3.bf16.xpose.msra.mxu1 %v1090_v34  ;;  %3852 = vmatprep.subr.bf16.mxu0 %v4739_v4  ;;  %v5053_v39 = vpop.f32.mrb[4].mxu1  ;;  %v386_v34 = vsub.s32 7, %v5027_v12 }
 0x1a8   : > { %3884 = vmatprep.subr.bf16.mxu1 %v4739_v4  ;;  %v5055_v40 = vpop.f32.mrb[5].mxu1  ;;  %v383_v33 = vrot.slane %v5033_v19, %v382_v32 }
 0x1a9   : > { %v877_v41 = vpop.f32.mrb[6].mxu1 }
 0x1aa   : > { %v878_v42 = vpop.f32.mrb[7].mxu1  ;;  %v874_v36 = vadd.f32 %v5053_v39, %v383_v33  ;;  %v367_v41 = vrot.slane %v5033_v19, %v5094_v35  ;;  %v4335_v33 = vld [vmem:[#allocation7 + $0x48] ss:$104 sps:$4 sm:$0xff]  }
 0x1ab   : > { %v5101_v42 = vsub.s32 3, %v5027_v12 }
 0x1ac   : > { %v792_v39 = vadd.f32 %v5025_v10, %v367_v41  ;;  %v4337_v41 = vld [vmem:[#allocation7 + $0x4c] ss:$104 sps:$4 sm:$0xff]  }
 0x1ad   : > { %3849 = vmatmul.mubr.bf16.vlgmr.msra.gmra.mrb[8].mxu0 %v881_v37  ;;  %v387_v37 = vrot.slane %v5033_v19, %v386_v34 }
 0x1ae   : > { %3881 = vmatmul.mubr.bf16.vlgmr.msra.gmra.mrb[8].mxu1 %v1089_v38  ;;  %3854 = vmatprep.mubr.msk.bf16.mxu0 %vm4740_vm0, %v4739_v4 }
 0x1af   : > { %3886 = vmatprep.mubr.msk.bf16.mxu1 %vm4740_vm0, %v4739_v4  ;;  %3853 = vmatpush3.bf16.msra.mxu0 %v5062_v63 }
 0x1b0   : > { %3885 = vmatpush3.bf16.msra.mxu1 %v5062_v63  ;;  %3858 = vmatprep.subr.bf16.mxu0 %v4739_v4 }
 0x1b1   : > { %3890 = vmatprep.subr.bf16.mxu1 %v4739_v4 }
 0x280   : > { %v917_v43 = vpop.f32.mrb[8].mxu0 }
 0x281   : > { %v3850_v44 = vpop.f32.mrb[9].mxu0  ;;  %v1125_v45 = vpop.f32.mrb[8].mxu1  ;;  %v924_v46 = vsel %vm923_vm1, %v917_v43, -inf }
 0x282   : > { %v3882_v47 = vpop.f32.mrb[9].mxu1  ;;  %925 = vmax.xlane.f32.xlu0 %v924_v46  ;;  %v920_v48 = vpop.f32.mrb[10].mxu0  ;;  %v1131_v52 = vsel %vm923_vm1, %v1125_v45, -inf  ;;  %v876_v46 = vadd.f32 %v5055_v40, %v387_v37 }
 0x283   : > { %v3851_v49 = vpop.f32.mrb[11].mxu0  ;;  %v1128_v50 = vpop.f32.mrb[10].mxu1 }
 0x284   : > { %v3883_v51 = vpop.f32.mrb[11].mxu1  ;;  %v371_v50 = vrot.slane %v5033_v19, %v5101_v42 }
 0x286   : > { %1132 = vmax.xlane.f32.xlu0 %v1131_v52  ;;  %v1496_v52 = vpack.c.bf16 %v876_v46, %v876_v46  ;;  %v4340_v46 = vld [vmem:[#allocation7 + $0x2b8] ss:$104 sps:$4 sm:$0xff]  }
 0x30f   : > { %v926_v53 = vpop.xlane.xlu0 %925 }
 0x310   : > { %v927_v54 = vsub.f32 %v917_v43, %v926_v53 }
 0x312   : > { %v928_v55 = vmul.f32 1.442695, %v927_v54  ;;  %v1292_v54 = vpack.c.bf16 %v792_v39, %v792_v39  ;;  %v4344_v39 = vld [vmem:[#allocation7 + $0x458] ss:$104 sps:$4 sm:$0xff]  }
 0x313   : > { %v1133_v56 = vpop.xlane.xlu0 %1132 }
 0x314   : > { %4495 = vpow2.f32 %v928_v55  ;;  %v1134_v57 = vsub.f32 %v1125_v45, %v1133_v56  ;;  %v1293_v45 = vpack.c.bf16 %v874_v36, %v874_v36  ;;  %v794_v55 = vadd.f32 %v5029_v13, %v371_v50  ;;  %v880_v13 = vld [vmem:[#allocation8 + $0x3] ss:$0 sm:$0xff]  ;;  %v4345_v50 = vld [vmem:[#allocation7 + $0x38c] ss:$104 sps:$4 sm:$0xff]  }
 0x316   : > { %v1135_v58 = vmul.f32 1.442695, %v1134_v57  ;;  %v1495_v10 = vpack.c.bf16 %v794_v55, %v794_v55  ;;  %v4356_v55 = vld [vmem:[#allocation7 + $0x2c] ss:$104 sps:$4 sm:$0xff]  }
 0x318   : > { %4497 = vpow2.f32 %v1135_v58 }
 0x31e   : > { %v4496_v59 = vpop.eup %4495 }
 0x31f   : > { %v930_v60 = vsel %vm923_vm1, %v4496_v59, 0.0 }
 0x320   : > { %931 = vadd.xlane.f32.xlu1 %v930_v60 }
 0x322   : > { %v4498_v61 = vpop.eup %4497 }
 0x323   : > { %v1137_v62 = vsel %vm923_vm1, %v4498_v61, 0.0 }
 0x324   : > { %1138 = vadd.xlane.f32.xlu1 %v1137_v62 }
 0x3ad   : > { %v932_v1 = vpop.xlane.xlu1 %931 }
 0x3ae   : > { %4499 = vrcp.f32 %v932_v1 }
 0x3b1   : > { %v1139_v2 = vpop.xlane.xlu1 %1138 }
 0x3b2   : > { %4501 = vrcp.f32 %v1139_v2 }
 0x3b8   : > { %v4500_v3 = vpop.eup %4499 }
 0x3b9   : > { %v934_v5 = vmul.f32 %v4500_v3, %v4496_v59 }
 0x3bb   : > { %v935_v7 = vpack.c.bf16 %v934_v5, %v934_v5 }
 0x3bc   : > { %v4502_v8 = vpop.eup %4501 }
 0x3bd   : > { %v1141_v9 = vmul.f32 %v4502_v8, %v4498_v61  ;;  %3855 = vmatmul.mubr.msk.bf16.vlgmr.msra.gmra.mrb[12].mxu0 %vm923_vm1, %v935_v7 }
 0x3be   : > { %3859 = vmatpush3.bf16.msra.mxu0 %v4319_v6  ;;  %3874 = vmatprep.mubr.msk.bf16.mxu0 %vm4740_vm0, %v4739_v4 }
 0x3bf   : > { %v1142_v14 = vpack.c.bf16 %v1141_v9, %v1141_v9  ;;  %3860 = vmatprep.subr.bf16.mxu0 %v4739_v4 }
 0x3c1   : > { %3887 = vmatmul.mubr.msk.bf16.vlgmr.msra.gmra.mrb[12].mxu1 %vm923_vm1, %v1142_v14 }
 0x3c2   : > { %3861 = vmatpush3.bf16.msra.mxu0 %v4320_v25  ;;  %3891 = vmatpush3.bf16.msra.mxu1 %v4321_v11 }
 0x3c3   : > { %3862 = vmatprep.subr.bf16.mxu0 %v4739_v4  ;;  %3892 = vmatprep.subr.bf16.mxu1 %v4739_v4 }
 0x3c4   : > { %3906 = vmatprep.mubr.msk.bf16.mxu1 %vm4740_vm0, %v4739_v4 }
 0x3c6   : > { %3863 = vmatpush3.bf16.msra.mxu0 %v4322_v15  ;;  %3893 = vmatpush3.bf16.msra.mxu1 %v4323_v16 }
 0x3c7   : > { %3864 = vmatprep.subr.bf16.mxu0 %v4739_v4  ;;  %3894 = vmatprep.subr.bf16.mxu1 %v4739_v4 }
 0x3ca   : > { %3865 = vmatpush3.bf16.msra.mxu0 %v4324_v17  ;;  %3895 = vmatpush3.bf16.msra.mxu1 %v4325_v18 }
 0x3cb   : > { %3866 = vmatprep.subr.bf16.mxu0 %v4739_v4  ;;  %3896 = vmatprep.subr.bf16.mxu1 %v4739_v4 }
 0x3ce   : > { %3867 = vmatpush3.bf16.msra.mxu0 %v4326_v20  ;;  %3897 = vmatpush3.bf16.msra.mxu1 %v4327_v22 }
 0x3cf   : > { %3868 = vmatprep.subr.bf16.mxu0 %v4739_v4  ;;  %3898 = vmatprep.subr.bf16.mxu1 %v4739_v4 }
 0x3d2   : > { %3869 = vmatpush3.bf16.msra.mxu0 %v4328_v24  ;;  %3899 = vmatpush3.bf16.msra.mxu1 %v4329_v26 }
 0x3d3   : > { %3870 = vmatprep.subr.bf16.mxu0 %v4739_v4  ;;  %3900 = vmatprep.subr.bf16.mxu1 %v4739_v4 }
 0x3d6   : > { %3871 = vmatpush3.bf16.msra.mxu0 %v4330_v27  ;;  %3901 = vmatpush3.bf16.msra.mxu1 %v4331_v28 }
 0x3d7   : > { %3872 = vmatprep.subr.bf16.mxu0 %v4739_v4  ;;  %3902 = vmatprep.subr.bf16.mxu1 %v4739_v4 }
 0x3da   : > { %3873 = vmatpush3.bf16.msra.mxu0 %v4332_v29  ;;  %3903 = vmatpush3.bf16.msra.mxu1 %v4333_v30 }
 0x3db   : > { %3904 = vmatprep.subr.bf16.mxu1 %v4739_v4  ;;  %3910 = vmatprep.subr.bf16.mxu0 %v4739_v4 }
 0x3de   : > { %3905 = vmatpush3.bf16.msra.mxu1 %v4334_v31 }
 0x3df   : > { %3942 = vmatprep.subr.bf16.mxu1 %v4739_v4 }
 0x490   : > { %v977_v38 = vpop.f32.mrb[12].mxu0 }
 0x491   : > { %v999_v43 = vpack.c.bf16 %v977_v38, %v977_v38  ;;  %v3856_v44 = vpop.f32.mrb[13].mxu0  ;;  %v4336_v38 = vld [vmem:[#allocation7 + $0x118] ss:$104 sps:$4 sm:$0xff]  }
 0x492   : > { %v980_v47 = vpop.f32.mrb[14].mxu0  ;;  %v4338_v44 = vld [vmem:[#allocation7 + $0x1e8] ss:$104 sps:$4 sm:$0xff]  }
 0x493   : > { %v3857_v48 = vpop.f32.mrb[15].mxu0  ;;  %3875 = vmatmul.mubr.bf16.vlgmr.msra.gmra.mrb[16].mxu0 %v999_v43  ;;  %v4341_v47 = vld [vmem:[#allocation7 + $0x1ec] ss:$104 sps:$4 sm:$0xff]  }
 0x494   : > { %3911 = vmatpush3.bf16.xpose.msra.mxu0 %v1293_v45  ;;  %v1180_v49 = vpop.f32.mrb[12].mxu1  ;;  %3912 = vmatprep.mubr.msk.bf16.mxu0 %vm4740_vm0, %v4739_v4  ;;  %v4339_v45 = vld [vmem:[#allocation7 + $0x11c] ss:$104 sps:$4 sm:$0xff]   ;;  %v4342_v48 = vld [vmem:[#allocation7 + $0x388] ss:$104 sps:$4 sm:$0xff]  }
 0x495   : > { %v1202_v12 = vpack.c.bf16 %v1180_v49, %v1180_v49  ;;  %v3888_v51 = vpop.f32.mrb[13].mxu1  ;;  %3916 = vmatprep.subr.bf16.mxu0 %v4739_v4  ;;  %v4343_v49 = vld [vmem:[#allocation7 + $0x2bc] ss:$104 sps:$4 sm:$0xff]  }
 0x496   : > { %v1183_v53 = vpop.f32.mrb[14].mxu1  ;;  %v4347_v51 = vld [vmem:[#allocation7 + $0x45c] ss:$104 sps:$4 sm:$0xff]  }
 0x497   : > { %v3889_v40 = vpop.f32.mrb[15].mxu1  ;;  %3907 = vmatmul.mubr.bf16.vlgmr.msra.gmra.mrb[16].mxu1 %v1202_v12  ;;  %v4346_v12 = vld [vmem:[#allocation7 + $0x528] ss:$104 sps:$4 sm:$0xff]   ;;  %v4349_v53 = vld [vmem:[#allocation7 + $0x52c] ss:$104 sps:$4 sm:$0xff]  }
 0x498   : > { %3943 = vmatpush3.bf16.xpose.msra.mxu1 %v1496_v52  ;;  %3944 = vmatprep.mubr.msk.bf16.mxu1 %vm4740_vm0, %v4739_v4  ;;  %v4348_v52 = vld [vmem:[#allocation7 + $0x5f8] ss:$104 sps:$4 sm:$0xff]   ;;  %v4350_v40 = vld [vmem:[#allocation7 + $0x5fc] ss:$104 sps:$4 sm:$0xff]  }
 0x499   : > { %3948 = vmatprep.subr.bf16.mxu1 %v4739_v4 }
 0x49b   : > { %3913 = vmatmul.mubr.bf16.vlgmr.msra.gmra.mrb[20].mxu0 %v1292_v54  ;;  %v4353_v54 = vld [vmem:[#allocation7 + $0x24] ss:$104 sps:$4 sm:$0xff]  }
 0x49c   : > { %3917 = vmatpush3.bf16.msra.mxu0 %v5062_v63  ;;  %3918 = vmatprep.mubr.msk.bf16.mxu0 %vm4740_vm0, %v4739_v4 }
 0x49d   : > { %3922 = vmatprep.subr.bf16.mxu0 %v4739_v4 }
 0x49f   : > { %3945 = vmatmul.mubr.bf16.vlgmr.msra.gmra.mrb[20].mxu1 %v1495_v10 }
 0x4a0   : > { %3949 = vmatpush3.bf16.msra.mxu1 %v5062_v63  ;;  %3950 = vmatprep.mubr.msk.bf16.mxu1 %vm4740_vm0, %v4739_v4 }
 0x4a1   : > { %3954 = vmatprep.subr.bf16.mxu1 %v4739_v4 }
 0x566   : > { %v1082_v19 = vpop.f32.mrb[16].mxu0 }
 0x567   : > { %v3876_v56 = vpop.f32.mrb[17].mxu0  ;;  %v1088_v58 = vadd.f32 %v1082_v19, %v880_v13  ;;  %v4351_v13 = vld [vmem:[#allocation7 + $0x20] ss:$104 sps:$4 sm:$0xff]  }
 0x568   : > { %v1085_v57 = vpop.f32.mrb[18].mxu0 }
 0x569   : > { %v3877_v59 = vpop.f32.mrb[19].mxu0  ;;  %v4359_v57 = vld [vmem:[#allocation7 + $0xf4] ss:$104 sps:$4 sm:$0xff]  }
 0x56a   : > { %v1285_v60 = vpop.f32.mrb[16].mxu1 }
 0x56b   : > { %v5122_v61 = vadd.f32 %v1285_v60, %v1088_v58  ;;  %v3908_v62 = vpop.f32.mrb[17].mxu1 }
 0x56c   : > { %v1288_v1 = vpop.f32.mrb[18].mxu1  ;;  %v4354_v62 = vld [vmem:[#allocation7 + $0x28] ss:$104 sps:$4 sm:$0xff]  }
 0x56d   : > { %v3909_v2 = vpop.f32.mrb[19].mxu1  ;;  %v4357_v1 = vld [vmem:[#allocation7 + $0xf0] ss:$104 sps:$4 sm:$0xff]  }
 0x56e   : > { %v1328_v3 = vpop.f32.mrb[20].mxu0 }
 0x56f   : > { %v3914_v5 = vpop.f32.mrb[21].mxu0  ;;  %v1334_v63 = vsel %vm923_vm1, %v1328_v3, -inf }
 0x570   : > { %1335 = vmax.xlane.f32.xlu0 %v1334_v63  ;;  %v1331_v6 = vpop.f32.mrb[22].mxu0  ;;  %v4362_v5 = vld [vmem:[#allocation7 + $0xfc] ss:$104 sps:$4 sm:$0xff]  }
 0x571   : > { %v3915_v7 = vpop.f32.mrb[23].mxu0  ;;  %v4365_v63 = vld [vmem:[#allocation7 + $0x1c4] ss:$104 sps:$4 sm:$0xff]  }
 0x572   : > { %v1531_v8 = vpop.f32.mrb[20].mxu1 }
 0x573   : > { %v3946_v9 = vpop.f32.mrb[21].mxu1  ;;  %v1537_v25 = vsel %vm923_vm1, %v1531_v8, -inf }
 0x574   : > { %1538 = vmax.xlane.f32.xlu1 %v1537_v25  ;;  %v1534_v11 = vpop.f32.mrb[22].mxu1  ;;  %v4363_v9 = vld [vmem:[#allocation7 + $0x1c0] ss:$104 sps:$4 sm:$0xff]   ;;  %v4368_v25 = vld [vmem:[#allocation7 + $0x1cc] ss:$104 sps:$4 sm:$0xff]  }
 0x575   : > { %v3947_v14 = vpop.f32.mrb[23].mxu1  ;;  %v4371_v11 = vld [vmem:[#allocation7 + $0x294] ss:$104 sps:$4 sm:$0xff]  }
 0x576   : > { %v4366_v14 = vld [vmem:[#allocation7 + $0x1c8] ss:$104 sps:$4 sm:$0xff]  }
 0x5fd   : > { %v1336_v15 = vpop.xlane.xlu0 %1335 }
 0x5fe   : > { %v1337_v16 = vsub.f32 %v1328_v3, %v1336_v15  ;;  %v4369_v15 = vld [vmem:[#allocation7 + $0x290] ss:$104 sps:$4 sm:$0xff]  }
 0x600   : > { %v1338_v17 = vmul.f32 1.442695, %v1337_v16  ;;  %v4374_v16 = vld [vmem:[#allocation7 + $0x29c] ss:$104 sps:$4 sm:$0xff]  }
 0x601   : > { %v1539_v18 = vpop.xlane.xlu1 %1538 }
 0x602   : > { %4503 = vpow2.f32 %v1338_v17  ;;  %v1540_v20 = vsub.f32 %v1531_v8, %v1539_v18  ;;  %v4360_v8 = vld [vmem:[#allocation7 + $0xf8] ss:$104 sps:$4 sm:$0xff]   ;;  %v4377_v17 = vld [vmem:[#allocation7 + $0x364] ss:$104 sps:$4 sm:$0xff]  }
 0x603   : > { %v4372_v18 = vld [vmem:[#allocation7 + $0x298] ss:$104 sps:$4 sm:$0xff]  }
 0x604   : > { %v1541_v22 = vmul.f32 1.442695, %v1540_v20  ;;  %v4375_v20 = vld [vmem:[#allocation7 + $0x360] ss:$104 sps:$4 sm:$0xff]  }
 0x606   : > { %4505 = vpow2.f32 %v1541_v22  ;;  %v4380_v22 = vld [vmem:[#allocation7 + $0x36c] ss:$104 sps:$4 sm:$0xff]  }
 0x60c   : > { %v4504_v24 = vpop.eup %4503 }
 0x60d   : > { %v1340_v26 = vsel %vm923_vm1, %v4504_v24, 0.0 }
 0x60e   : > { %1341 = vadd.xlane.f32.xlu0 %v1340_v26  ;;  %v4378_v26 = vld [vmem:[#allocation7 + $0x368] ss:$104 sps:$4 sm:$0xff]  }
 0x610   : > { %v4506_v27 = vpop.eup %4505 }
 0x611   : > { %v1543_v28 = vsel %vm923_vm1, %v4506_v27, 0.0 }
 0x612   : > { %1544 = vadd.xlane.f32.xlu1 %v1543_v28  ;;  %v4386_v28 = vld [vmem:[#allocation7 + $0x43c] ss:$104 sps:$4 sm:$0xff]  }
 0x69b   : > { %v1342_v29 = vpop.xlane.xlu0 %1341 }
 0x69c   : > { %4507 = vrcp.f32 %v1342_v29  ;;  %v4384_v29 = vld [vmem:[#allocation7 + $0x438] ss:$104 sps:$4 sm:$0xff]  }
 0x69f   : > { %v1545_v30 = vpop.xlane.xlu1 %1544 }
 0x6a0   : > { %4509 = vrcp.f32 %v1545_v30  ;;  %v4389_v30 = vld [vmem:[#allocation7 + $0x504] ss:$104 sps:$4 sm:$0xff]  }
 0x6a6   : > { %v4508_v31 = vpop.eup %4507 }
 0x6a7   : > { %v1344_v32 = vmul.f32 %v4508_v31, %v4504_v24  ;;  %v4383_v24 = vld [vmem:[#allocation7 + $0x434] ss:$104 sps:$4 sm:$0xff]   ;;  %v4387_v31 = vld [vmem:[#allocation7 + $0x500] ss:$104 sps:$4 sm:$0xff]  }
 0x6a9   : > { %v1345_v34 = vpack.c.bf16 %v1344_v32, %v1344_v32  ;;  %v4392_v32 = vld [vmem:[#allocation7 + $0x50c] ss:$104 sps:$4 sm:$0xff]  }
 0x6aa   : > { %v4510_v36 = vpop.eup %4509 }
 0x6ab   : > { %v1547_v37 = vmul.f32 %v4510_v36, %v4506_v27  ;;  %3919 = vmatmul.mubr.msk.bf16.vlgmr.msra.gmra.mrb[24].mxu0 %vm923_vm1, %v1345_v34  ;;  %v4381_v27 = vld [vmem:[#allocation7 + $0x430] ss:$104 sps:$4 sm:$0xff]   ;;  %v4395_v34 = vld [vmem:[#allocation7 + $0x5d4] ss:$104 sps:$4 sm:$0xff]  }
 0x6ac   : > { %3923 = vmatpush3.bf16.msra.mxu0 %v4335_v33  ;;  %3938 = vmatprep.mubr.msk.bf16.mxu0 %vm4740_vm0, %v4739_v4  ;;  %v4390_v33 = vld [vmem:[#allocation7 + $0x508] ss:$104 sps:$4 sm:$0xff]  }
 0x6ad   : > { %v1548_v43 = vpack.c.bf16 %v1547_v37, %v1547_v37  ;;  %3924 = vmatprep.subr.bf16.mxu0 %v4739_v4  ;;  %v4393_v36 = vld [vmem:[#allocation7 + $0x5d0] ss:$104 sps:$4 sm:$0xff]   ;;  %v4398_v37 = vld [vmem:[#allocation7 + $0x5dc] ss:$104 sps:$4 sm:$0xff]  }
 0x6af   : > { %3951 = vmatmul.mubr.msk.bf16.vlgmr.msra.gmra.mrb[24].mxu1 %vm923_vm1, %v1548_v43 }
 0x6b0   : > { %3925 = vmatpush3.bf16.msra.mxu0 %v4336_v38  ;;  %3955 = vmatpush3.bf16.msra.mxu1 %v4337_v41  ;;  %v4396_v38 = vld [vmem:[#allocation7 + $0x5d8] ss:$104 sps:$4 sm:$0xff]   ;;  %v4401_v41 = vld [vmem:[#allocation7 + $0x34] ss:$104 sps:$4 sm:$0xff]  }
 0x6b1   : > { %3926 = vmatprep.subr.bf16.mxu0 %v4739_v4  ;;  %3956 = vmatprep.subr.bf16.mxu1 %v4739_v4 }
 0x6b2   : > { %3970 = vmatprep.mubr.msk.bf16.mxu1 %vm4740_vm0, %v4739_v4 }
 0x6b4   : > { %3927 = vmatpush3.bf16.msra.mxu0 %v4338_v44  ;;  %3957 = vmatpush3.bf16.msra.mxu1 %v4339_v45 }
 0x6b5   : > { %3928 = vmatprep.subr.bf16.mxu0 %v4739_v4  ;;  %3958 = vmatprep.subr.bf16.mxu1 %v4739_v4 }
 0x6b8   : > { %3929 = vmatpush3.bf16.msra.mxu0 %v4340_v46  ;;  %3959 = vmatpush3.bf16.msra.mxu1 %v4341_v47 }
 0x6b9   : > { %3930 = vmatprep.subr.bf16.mxu0 %v4739_v4  ;;  %3960 = vmatprep.subr.bf16.mxu1 %v4739_v4 }
 0x6bc   : > { %3931 = vmatpush3.bf16.msra.mxu0 %v4342_v48  ;;  %3961 = vmatpush3.bf16.msra.mxu1 %v4343_v49 }
 0x6bd   : > { %3932 = vmatprep.subr.bf16.mxu0 %v4739_v4  ;;  %3962 = vmatprep.subr.bf16.mxu1 %v4739_v4 }
 0x6c0   : > { %3933 = vmatpush3.bf16.msra.mxu0 %v4344_v39  ;;  %3963 = vmatpush3.bf16.msra.mxu1 %v4345_v50 }
 0x6c1   : > { %3934 = vmatprep.subr.bf16.mxu0 %v4739_v4  ;;  %3964 = vmatprep.subr.bf16.mxu1 %v4739_v4 }
 0x6c4   : > { %3935 = vmatpush3.bf16.msra.mxu0 %v4346_v12  ;;  %3965 = vmatpush3.bf16.msra.mxu1 %v4347_v51  ;;  %v4531_v12 = vld [vmem:[%s4986_s7] sm:$0xff] }
 0x6c5   : > { %3936 = vmatprep.subr.bf16.mxu0 %v4739_v4  ;;  %3966 = vmatprep.subr.bf16.mxu1 %v4739_v4 }
 0x6c8   : > { %3937 = vmatpush3.bf16.msra.mxu0 %v4348_v52  ;;  %3967 = vmatpush3.bf16.msra.mxu1 %v4349_v53  ;;  %v4399_v53 = vld [vmem:[#allocation7 + $0x30] ss:$104 sps:$4 sm:$0xff]  }
 0x6c9   : > { %3968 = vmatprep.subr.bf16.mxu1 %v4739_v4  ;;  %1915 = vmatprep.subr.bf16.mxu0 %v4353_v54  ;;  %v4404_v54 = vld [vmem:[#allocation7 + $0x104] ss:$104 sps:$4 sm:$0xff]  }
 0x6cc   : > { %3969 = vmatpush3.bf16.msra.mxu1 %v4350_v40 }
 0x6cd   : > { %1956 = vmatprep.subr.bf16.mxu1 %v4356_v55  ;;  %v4407_v55 = vld [vmem:[#allocation7 + $0x1d4] ss:$104 sps:$4 sm:$0xff]  }
 0x77e   : > { %v1383_v10 = vpop.f32.mrb[24].mxu0 }
 0x77f   : > { %v1405_v19 = vpack.c.bf16 %v1383_v10, %v1383_v10  ;;  %v3920_v56 = vpop.f32.mrb[25].mxu0  ;;  %v4405_v10 = vld [vmem:[#allocation7 + $0x1d0] ss:$104 sps:$4 sm:$0xff]  }
 0x780   : > { %v1386_v58 = vpop.f32.mrb[26].mxu0  ;;  %v4413_v56 = vld [vmem:[#allocation7 + $0x374] ss:$104 sps:$4 sm:$0xff]  }
 0x781   : > { %v3921_v59 = vpop.f32.mrb[27].mxu0  ;;  %3939 = vmatmul.mubr.bf16.vlgmr.msra.gmra.mrb[28].mxu0 %v1405_v19  ;;  %v4408_v19 = vld [vmem:[#allocation7 + $0x2a0] ss:$104 sps:$4 sm:$0xff]   ;;  %v4416_v58 = vld [vmem:[#allocation7 + $0x444] ss:$104 sps:$4 sm:$0xff]  }
 0x782   : > { %v1586_v60 = vpop.f32.mrb[24].mxu1  ;;  %1916 = vmatpush1.bf16.msra.mxu0 %v4351_v13  ;;  %1947 = vmatprep.mubr.bf16.mxu0 %v4738_v0  ;;  %v4410_v13 = vld [vmem:[#allocation7 + $0x2a4] ss:$104 sps:$4 sm:$0xff]   ;;  %v4414_v59 = vld [vmem:[#allocation7 + $0x440] ss:$104 sps:$4 sm:$0xff]  }
 0x783   : > { %v1608_v2 = vpack.c.bf16 %v1586_v60, %v1586_v60  ;;  %v3952_v3 = vpop.f32.mrb[25].mxu1  ;;  %1917 = vmatprep.subr.bf16.mxu0 %v4359_v57  ;;  %v4411_v57 = vld [vmem:[#allocation7 + $0x370] ss:$104 sps:$4 sm:$0xff]   ;;  %v4419_v60 = vld [vmem:[#allocation7 + $0x514] ss:$104 sps:$4 sm:$0xff]  }
 0x784   : > { %v1589_v6 = vpop.f32.mrb[26].mxu1  ;;  %v285_v3 = vld [vmem:[%s4994_s5 + $0x8] sm:$0xff] }
 0x785   : > { %v3953_v7 = vpop.f32.mrb[27].mxu1  ;;  %3971 = vmatmul.mubr.bf16.vlgmr.msra.gmra.mrb[28].mxu1 %v1608_v2  ;;  %v284_v2 = vld [vmem:[%s4994_s5] sm:$0xff] }
 0x786   : > { %1957 = vmatpush1.bf16.msra.mxu1 %v4354_v62  ;;  %1918 = vmatpush1.bf16.msra.mxu0 %v4357_v1  ;;  %v4422_v62 = vld [vmem:[#allocation7 + $0x5e4] ss:$104 sps:$4 sm:$0xff]   ;;  %v4420_v1 = vld [vmem:[#allocation7 + $0x5e0] ss:$104 sps:$4 sm:$0xff]  }
 0x787   : > { %1958 = vmatprep.subr.bf16.mxu1 %v4362_v5  ;;  %1919 = vmatprep.subr.bf16.mxu0 %v4365_v63  ;;  %v5160_v5 = vpack.c.bf16 %v285_v3, %v284_v2  ;;  %v4425_v63 = vld [vmem:[#allocation7 + $0x3c] ss:$104 sps:$4 sm:$0xff]   ;;  %v4423_v6 = vld [vmem:[#allocation7 + $0x38] ss:$104 sps:$4 sm:$0xff]   ;;  %v4426_v7 = vld [vmem:[#allocation7 + $0x108] ss:$104 sps:$4 sm:$0xff]  }
 0x788   : > { %1988 = vmatprep.mubr.bf16.mxu1 %v4738_v0 }
 0x78a   : > { %1959 = vmatpush1.bf16.msra.mxu1 %v4360_v8  ;;  %1920 = vmatpush1.bf16.msra.mxu0 %v4363_v9  ;;  %v4428_v8 = vld [vmem:[#allocation7 + $0x10c] ss:$104 sps:$4 sm:$0xff]   ;;  %v4431_v9 = vld [vmem:[#allocation7 + $0x1dc] ss:$104 sps:$4 sm:$0xff]  }
 0x78b   : > { %1960 = vmatprep.subr.bf16.mxu1 %v4368_v25  ;;  %1921 = vmatprep.subr.bf16.mxu0 %v4371_v11  ;;  %v4429_v25 = vld [vmem:[#allocation7 + $0x1d8] ss:$104 sps:$4 sm:$0xff]   ;;  %v4434_v11 = vld [vmem:[#allocation7 + $0x2ac] ss:$104 sps:$4 sm:$0xff]  }
 0x78e   : > { %1961 = vmatpush1.bf16.msra.mxu1 %v4366_v14  ;;  %1922 = vmatpush1.bf16.msra.mxu0 %v4369_v15  ;;  %v4432_v14 = vld [vmem:[#allocation7 + $0x2a8] ss:$104 sps:$4 sm:$0xff]   ;;  %v4437_v15 = vld [vmem:[#allocation7 + $0x37c] ss:$104 sps:$4 sm:$0xff]  }
 0x78f   : > { %1962 = vmatprep.subr.bf16.mxu1 %v4374_v16  ;;  %1923 = vmatprep.subr.bf16.mxu0 %v4377_v17  ;;  %v4435_v16 = vld [vmem:[#allocation7 + $0x378] ss:$104 sps:$4 sm:$0xff]   ;;  %v4440_v17 = vld [vmem:[#allocation7 + $0x44c] ss:$104 sps:$4 sm:$0xff]  }
 0x792   : > { %1963 = vmatpush1.bf16.msra.mxu1 %v4372_v18  ;;  %1924 = vmatpush1.bf16.msra.mxu0 %v4375_v20  ;;  %v4438_v18 = vld [vmem:[#allocation7 + $0x448] ss:$104 sps:$4 sm:$0xff]   ;;  %v4443_v20 = vld [vmem:[#allocation7 + $0x51c] ss:$104 sps:$4 sm:$0xff]  }
 0x793   : > { %1964 = vmatprep.subr.bf16.mxu1 %v4380_v22  ;;  %1925 = vmatprep.subr.bf16.mxu0 %v4383_v24  ;;  %v4441_v22 = vld [vmem:[#allocation7 + $0x518] ss:$104 sps:$4 sm:$0xff]   ;;  %v4446_v24 = vld [vmem:[#allocation7 + $0x5ec] ss:$104 sps:$4 sm:$0xff]  }
 0x796   : > { %1965 = vmatpush1.bf16.msra.mxu1 %v4378_v26  ;;  %1926 = vmatpush1.bf16.msra.mxu0 %v4381_v27  ;;  %v4444_v26 = vld [vmem:[#allocation7 + $0x5e8] ss:$104 sps:$4 sm:$0xff]  }
 0x797   : > { %1966 = vmatprep.subr.bf16.mxu1 %v4386_v28  ;;  %1927 = vmatprep.subr.bf16.mxu0 %v4389_v30 }
 0x79a   : > { %1967 = vmatpush1.bf16.msra.mxu1 %v4384_v29  ;;  %1928 = vmatpush1.bf16.msra.mxu0 %v4387_v31 }
 0x79b   : > { %1968 = vmatprep.subr.bf16.mxu1 %v4392_v32  ;;  %1929 = vmatprep.subr.bf16.mxu0 %v4395_v34 }
 0x79e   : > { %1969 = vmatpush1.bf16.msra.mxu1 %v4390_v33  ;;  %1930 = vmatpush1.bf16.msra.mxu0 %v4393_v36  ;;  %v2030_v36 = vld [vmem:[#allocation8 + $0x2] ss:$8 sm:$0xf] }
 0x79f   : > { %1970 = vmatprep.subr.bf16.mxu1 %v4398_v37  ;;  %2212 = vmatprep.subr.bf16.mxu0 %v4401_v41  ;;  %v2035_v37 = vrot.slane %v2030_v36, %v5037_v21  ;;  %v2039_v41 = vrot.slane %v2030_v36, %v5041_v23 }
 0x7a2   : > { %1971 = vmatpush1.bf16.msra.mxu1 %v4396_v38 }
 0x7a3   : > { %2255 = vmatprep.subr.bf16.mxu1 %v4425_v63 }
 0x854   : > { %v1488_v43 = vpop.f32.mrb[28].mxu0 }
 0x855   : > { %v1494_v44 = vadd.f32 %v1488_v43, %v5122_v61  ;;  %v3940_v45 = vpop.f32.mrb[29].mxu0  ;;  %v4402_v61 = vld [vmem:[#allocation7 + $0x100] ss:$104 sps:$4 sm:$0xff]  }
 0x856   : > { %v1491_v46 = vpop.f32.mrb[30].mxu0  ;;  %v5176_v43 = vld [vmem:[#allocation8 + $0x1] ss:$8 sm:$0xf] }
 0x857   : > { %v3941_v47 = vpop.f32.mrb[31].mxu0 }
 0x858   : > { %v1691_v48 = vpop.f32.mrb[28].mxu1 }
 0x859   : > { %v1697_v49 = vadd.f32 %v1691_v48, %v1494_v44  ;;  %v3972_v39 = vpop.f32.mrb[29].mxu1 }
 0x85a   : > { %v1694_v50 = vpop.f32.mrb[30].mxu1 }
 0x85b   : > { %v5152_v51 = vadd.f32 %v4531_v12, %v1697_v49  ;;  %v3973_v52 = vpop.f32.mrb[31].mxu1  ;;  %v1738_v49 = vrot.slane %v5176_v43, %v5037_v21  ;;  %v1742_v12 = vrot.slane %v5176_v43, %v5041_v23  ;;  %v2043_v21 = vrot.slane %v2030_v36, %v5094_v35 }
 0x85c   : > { %v2047_v23 = vrot.slane %v2030_v36, %v5101_v42 }
 0x85d   : > { %v1699_v40 = vpack.c.bf16 %v5152_v51, %v5152_v51 }
 0x85f   : > { %1948 = vmatmul.mubr.bf16.vlgmr.msra.gmra.mrb[32].mxu0 %v1699_v40  ;;  %1989 = vmatmul.mubr.bf16.vlgmr.msra.gmra.mrb[32].mxu1 %v1699_v40 }
 0x860   : > { %2213 = vmatpush1.bf16.msra.mxu0 %v4399_v53  ;;  %2244 = vmatprep.mubr.bf16.mxu0 %v4738_v0 }
 0x861   : > { %2214 = vmatprep.subr.bf16.mxu0 %v4404_v54  ;;  %2287 = vmatprep.mubr.bf16.mxu1 %v4738_v0  ;;  %v4417_v0 = vld [vmem:[#allocation7 + $0x510] ss:$104 sps:$4 sm:$0xff]  }
 0x862   : > { %2256 = vmatpush1.bf16.msra.mxu1 %v4423_v6 }
 0x863   : > { %2257 = vmatprep.subr.bf16.mxu1 %v4428_v8 }
 0x864   : > { %2215 = vmatpush1.bf16.msra.mxu0 %v4402_v61 }
 0x865   : > { %2216 = vmatprep.subr.bf16.mxu0 %v4407_v55 }
 0x866   : > { %2258 = vmatpush1.bf16.msra.mxu1 %v4426_v7 }
 0x867   : > { %2259 = vmatprep.subr.bf16.mxu1 %v4431_v9 }
 0x868   : > { %2217 = vmatpush1.bf16.msra.mxu0 %v4405_v10 }
 0x869   : > { %2218 = vmatprep.subr.bf16.mxu0 %v4410_v13 }
 0x86a   : > { %2260 = vmatpush1.bf16.msra.mxu1 %v4429_v25 }
 0x86b   : > { %2261 = vmatprep.subr.bf16.mxu1 %v4434_v11 }
 0x86c   : > { %2219 = vmatpush1.bf16.msra.mxu0 %v4408_v19 }
 0x86d   : > { %2220 = vmatprep.subr.bf16.mxu0 %v4413_v56 }
 0x86e   : > { %2262 = vmatpush1.bf16.msra.mxu1 %v4432_v14 }
 0x86f   : > { %2263 = vmatprep.subr.bf16.mxu1 %v4437_v15 }
 0x870   : > { %2221 = vmatpush1.bf16.msra.mxu0 %v4411_v57 }
 0x871   : > { %2222 = vmatprep.subr.bf16.mxu0 %v4416_v58 }
 0x872   : > { %2264 = vmatpush1.bf16.msra.mxu1 %v4435_v16 }
 0x873   : > { %2265 = vmatprep.subr.bf16.mxu1 %v4440_v17 }
 0x874   : > { %2223 = vmatpush1.bf16.msra.mxu0 %v4414_v59 }
 0x875   : > { %2224 = vmatprep.subr.bf16.mxu0 %v4419_v60 }
 0x876   : > { %2266 = vmatpush1.bf16.msra.mxu1 %v4438_v18 }
 0x877   : > { %2267 = vmatprep.subr.bf16.mxu1 %v4443_v20 }
 0x878   : > { %2225 = vmatpush1.bf16.msra.mxu0 %v4417_v0 }
 0x879   : > { %2226 = vmatprep.subr.bf16.mxu0 %v4422_v62 }
 0x87a   : > { %2268 = vmatpush1.bf16.msra.mxu1 %v4441_v22 }
 0x87b   : > { %2269 = vmatprep.subr.bf16.mxu1 %v4446_v24 }
 0x87c   : > { %2227 = vmatpush1.bf16.msra.mxu0 %v4420_v1 }
 0x87d   : > { %3974 = vmatprep.subr.bf16.mxu0 %v4739_v4 }
 0x87e   : > { %2270 = vmatpush1.bf16.msra.mxu1 %v4444_v26 }
 0x87f   : > { %2245 = vmatmul.mubr.bf16.vlgmr.msra.gmra.mrb[36].mxu0 %v5160_v5  ;;  %4006 = vmatprep.subr.bf16.mxu1 %v4739_v4 }
 0x880   : > { %3976 = vmatprep.mubr.msk.bf16.mxu0 %vm4740_vm0, %v4739_v4 }
 0x881   : > { %2288 = vmatmul.mubr.bf16.vlgmr.msra.gmra.mrb[36].mxu1 %v5160_v5 }
 0x882   : > { %4008 = vmatprep.mubr.msk.bf16.mxu1 %vm4740_vm0, %v4739_v4 }
 0x932   : > { %v1949_v27 = vpop.f32.mrb[32].mxu0  ;;  %v5170_v28 = vpop.f32.mrb[32].mxu1 }
 0x933   : > { %v1951_v29 = vpop.f32.mrb[33].mxu0  ;;  %v5172_v30 = vpop.f32.mrb[33].mxu1  ;;  %v1950_v40 = vadd.f32 %v1949_v27, %v1738_v49  ;;  %v4453_v49 = vld [vmem:[#allocation7 + $0x2c0] ss:$104 sps:$4 sm:$0xff]  }
 0x934   : > { %v1953_v31 = vpop.f32.mrb[34].mxu0  ;;  %v1994_v32 = vpop.f32.mrb[34].mxu1  ;;  %v1952_v54 = vadd.f32 %v1951_v29, %v1742_v12  ;;  %v4456_v12 = vld [vmem:[#allocation7 + $0x394] ss:$104 sps:$4 sm:$0xff]  }
 0x935   : > { %v1954_v33 = vpop.f32.mrb[35].mxu0  ;;  %v1995_v34 = vpop.f32.mrb[35].mxu1  ;;  %v2299_v61 = vpack.c.bf16 %v1950_v40, %v1950_v40  ;;  %v4459_v40 = vld [vmem:[#allocation7 + $0x530] ss:$104 sps:$4 sm:$0xff]  }
 0x936   : > { %v2503_v55 = vpack.c.bf16 %v1952_v54, %v1952_v54  ;;  %v4460_v54 = vld [vmem:[#allocation7 + $0x534] ss:$104 sps:$4 sm:$0xff]  }
 0x952   : > { %v2246_v38 = vpop.f32.mrb[36].mxu0 }
 0x953   : > { %v2248_v44 = vpop.f32.mrb[37].mxu0  ;;  %v2247_v46 = vadd.f32 %v2246_v38, %v2035_v37 }
 0x954   : > { %v2250_v45 = vpop.f32.mrb[38].mxu0  ;;  %v2249_v39 = vadd.f32 %v2248_v44, %v2039_v41  ;;  %v2289_v10 = vpop.f32.mrb[36].mxu1 }
 0x955   : > { %v2251_v47 = vadd.f32 %v2250_v45, %v2035_v37  ;;  %v2252_v48 = vpop.f32.mrb[39].mxu0  ;;  %v5194_v13 = vadd.f32 %v2289_v10, %v2043_v21  ;;  %v2291_v19 = vpop.f32.mrb[37].mxu1  ;;  %v4447_v37 = vld [vmem:[#allocation7 + $0x50] ss:$104 sps:$4 sm:$0xff]   ;;  %v4449_v45 = vld [vmem:[#allocation7 + $0x120] ss:$104 sps:$4 sm:$0xff]  }
 0x956   : > { %v2253_v50 = vadd.f32 %v2252_v48, %v2039_v41  ;;  %v5196_v56 = vadd.f32 %v2291_v19, %v2047_v23  ;;  %v2293_v57 = vpop.f32.mrb[38].mxu1  ;;  %v4448_v41 = vld [vmem:[#allocation7 + $0x54] ss:$104 sps:$4 sm:$0xff]  }
 0x957   : > { %v2300_v52 = vpack.c.bf16 %v2251_v47, %v2247_v46  ;;  %v5198_v58 = vadd.f32 %v2293_v57, %v2043_v21  ;;  %v2295_v59 = vpop.f32.mrb[39].mxu1  ;;  %v4450_v46 = vld [vmem:[#allocation7 + $0x124] ss:$104 sps:$4 sm:$0xff]   ;;  %v4451_v47 = vld [vmem:[#allocation7 + $0x1f0] ss:$104 sps:$4 sm:$0xff]  }
 0x958   : > { %v2504_v53 = vpack.c.bf16 %v2253_v50, %v2249_v39  ;;  %v5200_v60 = vadd.f32 %v2295_v59, %v2047_v23  ;;  %v4452_v48 = vld [vmem:[#allocation7 + $0x1f4] ss:$104 sps:$4 sm:$0xff]   ;;  %v4454_v39 = vld [vmem:[#allocation7 + $0x2c4] ss:$104 sps:$4 sm:$0xff]   ;;  %v4455_v50 = vld [vmem:[#allocation7 + $0x390] ss:$104 sps:$4 sm:$0xff]   ;;  %v1746_v23 = vrot.slane %v5176_v43, %v5094_v35  ;;  %v1750_v59 = vrot.slane %v5176_v43, %v5101_v42 }
 0x959   : > { %3975 = vmatpush3.bf16.xpose.msra.mxu0 %v2300_v52  ;;  %v2707_v0 = vpack.c.bf16 %v5198_v58, %v5194_v13  ;;  %v4457_v52 = vld [vmem:[#allocation7 + $0x460] ss:$104 sps:$4 sm:$0xff]  }
 0x95a   : > { %4007 = vmatpush3.bf16.xpose.msra.mxu1 %v2504_v53  ;;  %3980 = vmatprep.subr.bf16.mxu0 %v4739_v4  ;;  %v2910_v62 = vpack.c.bf16 %v5200_v60, %v5196_v56  ;;  %v4458_v53 = vld [vmem:[#allocation7 + $0x464] ss:$104 sps:$4 sm:$0xff]   ;;  %v1991_v35 = vadd.f32 %v5170_v28, %v1746_v23  ;;  %v1993_v42 = vadd.f32 %v5172_v30, %v1750_v59  ;;  %v4471_v23 = vld [vmem:[#allocation7 + $0x398] ss:$104 sps:$4 sm:$0xff]  }
 0x95b   : > { %4012 = vmatprep.subr.bf16.mxu1 %v4739_v4  ;;  %v2298_v28 = vld [vmem:[#allocation8 + $0x4] ss:$0 sm:$0xff]  ;;  %v4475_v59 = vld [vmem:[#allocation7 + $0x538] ss:$104 sps:$4 sm:$0xff]  }
 0x95c   : > { %v2706_v43 = vpack.c.bf16 %v1991_v35, %v1991_v35  ;;  %v2909_v13 = vpack.c.bf16 %v1993_v42, %v1993_v42 }
 0x960   : > { %3977 = vmatmul.mubr.bf16.vlgmr.msra.gmra.mrb[40].mxu0 %v2299_v61  ;;  %v4461_v61 = vld [vmem:[#allocation7 + $0x600] ss:$104 sps:$4 sm:$0xff]  }
 0x961   : > { %4009 = vmatmul.mubr.bf16.vlgmr.msra.gmra.mrb[40].mxu1 %v2503_v55  ;;  %3981 = vmatpush3.bf16.msra.mxu0 %v5160_v5  ;;  %v4462_v55 = vld [vmem:[#allocation7 + $0x604] ss:$104 sps:$4 sm:$0xff]  }
 0x962   : > { %4013 = vmatpush3.bf16.msra.mxu1 %v5160_v5  ;;  %3982 = vmatprep.mubr.msk.bf16.mxu0 %vm4740_vm0, %v4739_v4 }
 0x963   : > { %4014 = vmatprep.mubr.msk.bf16.mxu1 %vm4740_vm0, %v4739_v4  ;;  %3986 = vmatprep.subr.bf16.mxu0 %v4739_v4 }
 0x964   : > { %4018 = vmatprep.subr.bf16.mxu1 %v4739_v4 }
 0xa33   : > { %v2335_v1 = vpop.f32.mrb[40].mxu0 }
 0xa34   : > { %v3978_v2 = vpop.f32.mrb[41].mxu0  ;;  %v2539_v3 = vpop.f32.mrb[40].mxu1  ;;  %v2342_v63 = vsel %vm2341_vm3, %v2335_v1, -inf }
 0xa35   : > { %v4010_v6 = vpop.f32.mrb[41].mxu1  ;;  %2343 = vmax.xlane.f32.xlu0 %v2342_v63  ;;  %v2338_v7 = vpop.f32.mrb[42].mxu0  ;;  %v2545_v8 = vsel %vm2341_vm3, %v2539_v3, -inf }
 0xa36   : > { %2546 = vmax.xlane.f32.xlu1 %v2545_v8  ;;  %v3979_v9 = vpop.f32.mrb[43].mxu0  ;;  %v2542_v25 = vpop.f32.mrb[42].mxu1 }
 0xa37   : > { %v4011_v11 = vpop.f32.mrb[43].mxu1 }
 0xac2   : > { %v2344_v14 = vpop.xlane.xlu0 %2343 }
 0xac3   : > { %v2345_v15 = vsub.f32 %v2335_v1, %v2344_v14  ;;  %v2547_v16 = vpop.xlane.xlu1 %2546 }
 0xac4   : > { %v2548_v17 = vsub.f32 %v2539_v3, %v2547_v16 }
 0xac5   : > { %v2346_v18 = vmul.f32 1.442695, %v2345_v15 }
 0xac6   : > { %v2549_v20 = vmul.f32 1.442695, %v2548_v17 }
 0xac7   : > { %4511 = vpow2.f32 %v2346_v18 }
 0xac8   : > { %4513 = vpow2.f32 %v2549_v20 }
 0xad1   : > { %v4512_v22 = vpop.eup %4511 }
 0xad2   : > { %v4514_v24 = vpop.eup %4513  ;;  %v2348_v26 = vsel %vm2341_vm3, %v4512_v22, 0.0 }
 0xad3   : > { %2349 = vadd.xlane.f32.xlu0 %v2348_v26  ;;  %v2551_v27 = vsel %vm2341_vm3, %v4514_v24, 0.0 }
 0xad4   : > { %2552 = vadd.xlane.f32.xlu1 %v2551_v27 }
 0xb60   : > { %v2350_v29 = vpop.xlane.xlu0 %2349 }
 0xb61   : > { %4515 = vrcp.f32 %v2350_v29  ;;  %v2553_v31 = vpop.xlane.xlu1 %2552 }
 0xb62   : > { %4517 = vrcp.f32 %v2553_v31 }
 0xb6b   : > { %v4516_v32 = vpop.eup %4515 }
 0xb6c   : > { %v4518_v33 = vpop.eup %4517  ;;  %v2352_v34 = vmul.f32 %v4516_v32, %v4512_v22 }
 0xb6d   : > { %v2555_v36 = vmul.f32 %v4518_v33, %v4514_v24 }
 0xb6e   : > { %v2353_v38 = vpack.c.bf16 %v2352_v34, %v2352_v34 }
 0xb6f   : > { %v2556_v44 = vpack.c.bf16 %v2555_v36, %v2555_v36 }
 0xb70   : > { %3983 = vmatmul.mubr.msk.bf16.vlgmr.msra.gmra.mrb[44].mxu0 %vm2341_vm3, %v2353_v38 }
 0xb71   : > { %4015 = vmatmul.mubr.msk.bf16.vlgmr.msra.gmra.mrb[44].mxu1 %vm2341_vm3, %v2556_v44  ;;  %3987 = vmatpush3.bf16.msra.mxu0 %v4447_v37 }
 0xb72   : > { %4019 = vmatpush3.bf16.msra.mxu1 %v4448_v41  ;;  %3988 = vmatprep.subr.bf16.mxu0 %v4739_v4 }
 0xb73   : > { %4020 = vmatprep.subr.bf16.mxu1 %v4739_v4  ;;  %4002 = vmatprep.mubr.msk.bf16.mxu0 %vm4740_vm0, %v4739_v4 }
 0xb74   : > { %4034 = vmatprep.mubr.msk.bf16.mxu1 %vm4740_vm0, %v4739_v4 }
 0xb75   : > { %3989 = vmatpush3.bf16.msra.mxu0 %v4449_v45 }
 0xb76   : > { %4021 = vmatpush3.bf16.msra.mxu1 %v4450_v46  ;;  %3990 = vmatprep.subr.bf16.mxu0 %v4739_v4 }
 0xb77   : > { %4022 = vmatprep.subr.bf16.mxu1 %v4739_v4 }
 0xb79   : > { %3991 = vmatpush3.bf16.msra.mxu0 %v4451_v47 }
 0xb7a   : > { %4023 = vmatpush3.bf16.msra.mxu1 %v4452_v48  ;;  %3992 = vmatprep.subr.bf16.mxu0 %v4739_v4 }
 0xb7b   : > { %4024 = vmatprep.subr.bf16.mxu1 %v4739_v4 }
 0xb7d   : > { %3993 = vmatpush3.bf16.msra.mxu0 %v4453_v49 }
 0xb7e   : > { %4025 = vmatpush3.bf16.msra.mxu1 %v4454_v39  ;;  %3994 = vmatprep.subr.bf16.mxu0 %v4739_v4  ;;  %v4463_v39 = vld [vmem:[#allocation7 + $0x58] ss:$104 sps:$4 sm:$0xff]  }
 0xb7f   : > { %4026 = vmatprep.subr.bf16.mxu1 %v4739_v4 }
 0xb81   : > { %3995 = vmatpush3.bf16.msra.mxu0 %v4455_v50 }
 0xb82   : > { %4027 = vmatpush3.bf16.msra.mxu1 %v4456_v12  ;;  %3996 = vmatprep.subr.bf16.mxu0 %v4739_v4  ;;  %v4464_v12 = vld [vmem:[#allocation7 + $0x5c] ss:$104 sps:$4 sm:$0xff]  }
 0xb83   : > { %4028 = vmatprep.subr.bf16.mxu1 %v4739_v4 }
 0xb85   : > { %3997 = vmatpush3.bf16.msra.mxu0 %v4457_v52 }
 0xb86   : > { %4029 = vmatpush3.bf16.msra.mxu1 %v4458_v53  ;;  %3998 = vmatprep.subr.bf16.mxu0 %v4739_v4  ;;  %v4465_v53 = vld [vmem:[#allocation7 + $0x128] ss:$104 sps:$4 sm:$0xff]  }
 0xb87   : > { %4030 = vmatprep.subr.bf16.mxu1 %v4739_v4 }
 0xb89   : > { %3999 = vmatpush3.bf16.msra.mxu0 %v4459_v40  ;;  %v4466_v40 = vld [vmem:[#allocation7 + $0x12c] ss:$104 sps:$4 sm:$0xff]  }
 0xb8a   : > { %4031 = vmatpush3.bf16.msra.mxu1 %v4460_v54  ;;  %4000 = vmatprep.subr.bf16.mxu0 %v4739_v4  ;;  %v4467_v54 = vld [vmem:[#allocation7 + $0x1f8] ss:$104 sps:$4 sm:$0xff]  }
 0xb8b   : > { %4032 = vmatprep.subr.bf16.mxu1 %v4739_v4 }
 0xb8d   : > { %4001 = vmatpush3.bf16.msra.mxu0 %v4461_v61  ;;  %v4468_v61 = vld [vmem:[#allocation7 + $0x1fc] ss:$104 sps:$4 sm:$0xff]  }
 0xb8e   : > { %4033 = vmatpush3.bf16.msra.mxu1 %v4462_v55  ;;  %4038 = vmatprep.subr.bf16.mxu0 %v4739_v4  ;;  %v4469_v55 = vld [vmem:[#allocation7 + $0x2c8] ss:$104 sps:$4 sm:$0xff]  }
 0xb8f   : > { %4070 = vmatprep.subr.bf16.mxu1 %v4739_v4 }
 0xc43   : > { %v2391_v21 = vpop.f32.mrb[44].mxu0 }
 0xc44   : > { %v2413_v10 = vpack.c.bf16 %v2391_v21, %v2391_v21  ;;  %v3984_v19 = vpop.f32.mrb[45].mxu0  ;;  %v2594_v57 = vpop.f32.mrb[44].mxu1  ;;  %v4470_v21 = vld [vmem:[#allocation7 + $0x2cc] ss:$104 sps:$4 sm:$0xff]  }
 0xc45   : > { %v2616_v1 = vpack.c.bf16 %v2594_v57, %v2594_v57  ;;  %v2394_v2 = vpop.f32.mrb[46].mxu0  ;;  %v4016_v3 = vpop.f32.mrb[45].mxu1  ;;  %v4473_v19 = vld [vmem:[#allocation7 + $0x468] ss:$104 sps:$4 sm:$0xff]   ;;  %v4474_v57 = vld [vmem:[#allocation7 + $0x46c] ss:$104 sps:$4 sm:$0xff]  }
 0xc46   : > { %v3985_v63 = vpop.f32.mrb[47].mxu0  ;;  %4003 = vmatmul.mubr.bf16.vlgmr.msra.gmra.mrb[48].mxu0 %v2413_v10  ;;  %v2597_v6 = vpop.f32.mrb[46].mxu1  ;;  %v4472_v10 = vld [vmem:[#allocation7 + $0x39c] ss:$104 sps:$4 sm:$0xff]   ;;  %v4477_v2 = vld [vmem:[#allocation7 + $0x608] ss:$104 sps:$4 sm:$0xff]  }
 0xc47   : > { %4039 = vmatpush3.bf16.xpose.msra.mxu0 %v2707_v0  ;;  %v4017_v7 = vpop.f32.mrb[47].mxu1  ;;  %4035 = vmatmul.mubr.bf16.vlgmr.msra.gmra.mrb[48].mxu1 %v2616_v1  ;;  %v4476_v1 = vld [vmem:[#allocation7 + $0x53c] ss:$104 sps:$4 sm:$0xff]   ;;  %v4478_v3 = vld [vmem:[#allocation7 + $0x60c] ss:$104 sps:$4 sm:$0xff]  }
 0xc48   : > { %4071 = vmatpush3.bf16.xpose.msra.mxu1 %v2910_v62  ;;  %4040 = vmatprep.mubr.msk.bf16.mxu0 %vm4740_vm0, %v4739_v4 }
 0xc49   : > { %4072 = vmatprep.mubr.msk.bf16.mxu1 %vm4740_vm0, %v4739_v4  ;;  %4044 = vmatprep.subr.bf16.mxu0 %v4739_v4 }
 0xc4a   : > { %4076 = vmatprep.subr.bf16.mxu1 %v4739_v4 }
 0xc4e   : > { %4041 = vmatmul.mubr.bf16.vlgmr.msra.gmra.mrb[52].mxu0 %v2706_v43 }
 0xc4f   : > { %4073 = vmatmul.mubr.bf16.vlgmr.msra.gmra.mrb[52].mxu1 %v2909_v13  ;;  %4045 = vmatpush3.bf16.msra.mxu0 %v5160_v5 }
 0xc50   : > { %4077 = vmatpush3.bf16.msra.mxu1 %v5160_v5  ;;  %4046 = vmatprep.mubr.msk.bf16.mxu0 %vm4740_vm0, %v4739_v4 }
 0xc51   : > { %4078 = vmatprep.mubr.msk.bf16.mxu1 %vm4740_vm0, %v4739_v4  ;;  %4050 = vmatprep.subr.bf16.mxu0 %v4739_v4 }
 0xc52   : > { %4082 = vmatprep.subr.bf16.mxu1 %v4739_v4 }
 0xd19   : > { %v2496_v30 = vpop.f32.mrb[48].mxu0 }
 0xd1a   : > { %v2502_v56 = vadd.f32 %v2496_v30, %v2298_v28  ;;  %v4004_v58 = vpop.f32.mrb[49].mxu0  ;;  %v2699_v60 = vpop.f32.mrb[48].mxu1 }
 0xd1b   : > { %v2499_v0 = vpop.f32.mrb[50].mxu0  ;;  %v4036_v62 = vpop.f32.mrb[49].mxu1 }
 0xd1c   : > { %v5258_v8 = vadd.f32 %v2699_v60, %v2502_v56  ;;  %v4005_v5 = vpop.f32.mrb[51].mxu0  ;;  %v2702_v9 = vpop.f32.mrb[50].mxu1 }
 0xd1d   : > { %v4037_v25 = vpop.f32.mrb[51].mxu1 }
 0xd21   : > { %v2742_v11 = vpop.f32.mrb[52].mxu0 }
 0xd22   : > { %v4042_v14 = vpop.f32.mrb[53].mxu0  ;;  %v2945_v15 = vpop.f32.mrb[52].mxu1  ;;  %v2748_v16 = vsel %vm2341_vm3, %v2742_v11, -inf }
 0xd23   : > { %v4074_v17 = vpop.f32.mrb[53].mxu1  ;;  %2749 = vmax.xlane.f32.xlu0 %v2748_v16  ;;  %v2745_v18 = vpop.f32.mrb[54].mxu0  ;;  %v2951_v20 = vsel %vm2341_vm3, %v2945_v15, -inf }
 0xd24   : > { %2952 = vmax.xlane.f32.xlu1 %v2951_v20  ;;  %v4043_v22 = vpop.f32.mrb[55].mxu0  ;;  %v2948_v24 = vpop.f32.mrb[54].mxu1  ;;  %v4479_v17 = vld [vmem:[#allocation7 + $0x60] ss:$104 sps:$4 sm:$0xff]   ;;  %v4480_v18 = vld [vmem:[#allocation7 + $0x130] ss:$104 sps:$4 sm:$0xff]  }
 0xd25   : > { %v4075_v26 = vpop.f32.mrb[55].mxu1  ;;  %v5297_v22 = vld [vmem:[#allocation8 + $0x43] ss:$0 sm:$0xff] }
 0xdb0   : > { %v2750_v27 = vpop.xlane.xlu0 %2749 }
 0xdb1   : > { %v2751_v29 = vsub.f32 %v2742_v11, %v2750_v27  ;;  %v2953_v31 = vpop.xlane.xlu1 %2952  ;;  %v4481_v27 = vld [vmem:[#allocation7 + $0x200] ss:$104 sps:$4 sm:$0xff]  }
 0xdb2   : > { %v2954_v32 = vsub.f32 %v2945_v15, %v2953_v31  ;;  %v4483_v31 = vld [vmem:[#allocation7 + $0x3a0] ss:$104 sps:$4 sm:$0xff]  }
 0xdb3   : > { %v2752_v33 = vmul.f32 1.442695, %v2751_v29  ;;  %v4482_v29 = vld [vmem:[#allocation7 + $0x2d0] ss:$104 sps:$4 sm:$0xff]  }
 0xdb4   : > { %v2955_v34 = vmul.f32 1.442695, %v2954_v32  ;;  %v4484_v32 = vld [vmem:[#allocation7 + $0x470] ss:$104 sps:$4 sm:$0xff]  }
 0xdb5   : > { %4519 = vpow2.f32 %v2752_v33  ;;  %v4485_v33 = vld [vmem:[#allocation7 + $0x540] ss:$104 sps:$4 sm:$0xff]  }
 0xdb6   : > { %4521 = vpow2.f32 %v2955_v34  ;;  %v4486_v34 = vld [vmem:[#allocation7 + $0x610] ss:$104 sps:$4 sm:$0xff]  }
 0xdbf   : > { %v4520_v36 = vpop.eup %4519 }
 0xdc0   : > { %v4522_v37 = vpop.eup %4521  ;;  %v2754_v38 = vsel %vm2341_vm3, %v4520_v36, 0.0 }
 0xdc1   : > { %2755 = vadd.xlane.f32.xlu0 %v2754_v38  ;;  %v2957_v41 = vsel %vm2341_vm3, %v4522_v37, 0.0  ;;  %v4489_v38 = vld [vmem:[#allocation7 + $0x204] ss:$104 sps:$4 sm:$0xff]  }
 0xdc2   : > { %2958 = vadd.xlane.f32.xlu1 %v2957_v41  ;;  %v4490_v41 = vld [vmem:[#allocation7 + $0x2d4] ss:$104 sps:$4 sm:$0xff]  }
 0xe4e   : > { %v2756_v44 = vpop.xlane.xlu0 %2755 }
 0xe4f   : > { %4523 = vrcp.f32 %v2756_v44  ;;  %v2959_v45 = vpop.xlane.xlu1 %2958  ;;  %v4491_v44 = vld [vmem:[#allocation7 + $0x3a4] ss:$104 sps:$4 sm:$0xff]  }
 0xe50   : > { %4525 = vrcp.f32 %v2959_v45  ;;  %v4492_v45 = vld [vmem:[#allocation7 + $0x474] ss:$104 sps:$4 sm:$0xff]  }
 0xe59   : > { %v4524_v46 = vpop.eup %4523 }
 0xe5a   : > { %v4526_v47 = vpop.eup %4525  ;;  %v2758_v48 = vmul.f32 %v4524_v46, %v4520_v36  ;;  %v4487_v36 = vld [vmem:[#allocation7 + $0x64] ss:$104 sps:$4 sm:$0xff]  }
 0xe5b   : > { %v2961_v49 = vmul.f32 %v4526_v47, %v4522_v37  ;;  %v4488_v37 = vld [vmem:[#allocation7 + $0x134] ss:$104 sps:$4 sm:$0xff]  }
 0xe5c   : > { %v2759_v50 = vpack.c.bf16 %v2758_v48, %v2758_v48 }
 0xe5d   : > { %v2962_v52 = vpack.c.bf16 %v2961_v49, %v2961_v49 }
 0xe5e   : > { %4047 = vmatmul.mubr.msk.bf16.vlgmr.msra.gmra.mrb[56].mxu0 %vm2341_vm3, %v2759_v50 }
 0xe5f   : > { %4079 = vmatmul.mubr.msk.bf16.vlgmr.msra.gmra.mrb[56].mxu1 %vm2341_vm3, %v2962_v52  ;;  %4051 = vmatpush3.bf16.msra.mxu0 %v4463_v39  ;;  %v3114_v39 = vld [vmem:[#allocation8 + $0x5] ss:$0 sm:$0xff] }
 0xe60   : > { %4083 = vmatpush3.bf16.msra.mxu1 %v4464_v12  ;;  %4052 = vmatprep.subr.bf16.mxu0 %v4739_v4  ;;  %v3115_v12 = vld [vmem:[#allocation8 + $0x6] ss:$0 sm:$0xff] }
 0xe61   : > { %4084 = vmatprep.subr.bf16.mxu1 %v4739_v4  ;;  %4066 = vmatprep.mubr.msk.bf16.mxu0 %vm4740_vm0, %v4739_v4 }
 0xe62   : > { %4098 = vmatprep.mubr.msk.bf16.mxu1 %vm4740_vm0, %v4739_v4 }
 0xe63   : > { %4053 = vmatpush3.bf16.msra.mxu0 %v4465_v53 }
 0xe64   : > { %4085 = vmatpush3.bf16.msra.mxu1 %v4466_v40  ;;  %4054 = vmatprep.subr.bf16.mxu0 %v4739_v4 }
 0xe65   : > { %4086 = vmatprep.subr.bf16.mxu1 %v4739_v4 }
 0xe67   : > { %4055 = vmatpush3.bf16.msra.mxu0 %v4467_v54  ;;  %v4493_v54 = vld [vmem:[#allocation7 + $0x544] ss:$104 sps:$4 sm:$0xff]  }
 0xe68   : > { %4087 = vmatpush3.bf16.msra.mxu1 %v4468_v61  ;;  %4056 = vmatprep.subr.bf16.mxu0 %v4739_v4  ;;  %v4494_v61 = vld [vmem:[#allocation7 + $0x614] ss:$104 sps:$4 sm:$0xff]  }
 0xe69   : > { %4088 = vmatprep.subr.bf16.mxu1 %v4739_v4 }
 0xe6b   : > { %4057 = vmatpush3.bf16.msra.mxu0 %v4469_v55  ;;  %v3147_v55 = vld [vmem:[#allocation8 + $0x7] ss:$0 sm:$0xff] }
 0xe6c   : > { %4089 = vmatpush3.bf16.msra.mxu1 %v4470_v21  ;;  %4058 = vmatprep.subr.bf16.mxu0 %v4739_v4 }
 0xe6d   : > { %4090 = vmatprep.subr.bf16.mxu1 %v4739_v4 }
 0xe6f   : > { %4059 = vmatpush3.bf16.msra.mxu0 %v4471_v23 }
 0xe70   : > { %4091 = vmatpush3.bf16.msra.mxu1 %v4472_v10  ;;  %4060 = vmatprep.subr.bf16.mxu0 %v4739_v4 }
 0xe71   : > { %4092 = vmatprep.subr.bf16.mxu1 %v4739_v4 }
 0xe73   : > { %4061 = vmatpush3.bf16.msra.mxu0 %v4473_v19 }
 0xe74   : > { %4093 = vmatpush3.bf16.msra.mxu1 %v4474_v57  ;;  %4062 = vmatprep.subr.bf16.mxu0 %v4739_v4 }
 0xe75   : > { %4094 = vmatprep.subr.bf16.mxu1 %v4739_v4 }
 0xe77   : > { %4063 = vmatpush3.bf16.msra.mxu0 %v4475_v59 }
 0xe78   : > { %4095 = vmatpush3.bf16.msra.mxu1 %v4476_v1  ;;  %4064 = vmatprep.subr.bf16.mxu0 %v4739_v4 }
 0xe79   : > { %4096 = vmatprep.subr.bf16.mxu1 %v4739_v4 }
 0xe7b   : > { %4065 = vmatpush3.bf16.msra.mxu0 %v4477_v2  ;;  %v3254_v2 = vld [vmem:[#allocation8 + $0x40] ss:$0 sm:$0xff] }
 0xe7c   : > { %4097 = vmatpush3.bf16.msra.mxu1 %v4478_v3  ;;  %4102 = vmatprep.subr.bf16.mxu0 %v4739_v4 }
 0xe7d   : > { %4122 = vmatprep.subr.bf16.mxu1 %v4739_v4 }
 0xf31   : > { %v2797_v63 = vpop.f32.mrb[56].mxu0 }
 0xf32   : > { %v2819_v6 = vpack.c.bf16 %v2797_v63, %v2797_v63  ;;  %v4048_v7 = vpop.f32.mrb[57].mxu0  ;;  %v3000_v35 = vpop.f32.mrb[56].mxu1 }
 0xf33   : > { %v3022_v42 = vpack.c.bf16 %v3000_v35, %v3000_v35  ;;  %v2800_v43 = vpop.f32.mrb[58].mxu0  ;;  %v4080_v13 = vpop.f32.mrb[57].mxu1 }
 0xf34   : > { %v4049_v28 = vpop.f32.mrb[59].mxu0  ;;  %4067 = vmatmul.mubr.bf16.vlgmr.msra.gmra.mrb[60].mxu0 %v2819_v6  ;;  %v3003_v30 = vpop.f32.mrb[58].mxu1 }
 0xf35   : > { %v4081_v56 = vpop.f32.mrb[59].mxu1  ;;  %4099 = vmatmul.mubr.bf16.vlgmr.msra.gmra.mrb[60].mxu1 %v3022_v42  ;;  %4118 = vmatprep.mubr.msk.bf16.mxu0 %vm4740_vm0, %v4739_v4 }
 0xf36   : > { %4138 = vmatprep.mubr.msk.bf16.mxu1 %vm4740_vm0, %v4739_v4  ;;  %4103 = vmatpush3.bf16.msra.mxu0 %v4479_v17 }
 0xf37   : > { %4104 = vmatprep.subr.bf16.mxu0 %v4739_v4  ;;  %4123 = vmatpush3.bf16.msra.mxu1 %v4487_v36 }
 0xf38   : > { %4124 = vmatprep.subr.bf16.mxu1 %v4739_v4 }
 0xf3a   : > { %4105 = vmatpush3.bf16.msra.mxu0 %v4480_v18 }
 0xf3b   : > { %4106 = vmatprep.subr.bf16.mxu0 %v4739_v4  ;;  %4125 = vmatpush3.bf16.msra.mxu1 %v4488_v37 }
 0xf3c   : > { %4126 = vmatprep.subr.bf16.mxu1 %v4739_v4 }
 0xf3e   : > { %4107 = vmatpush3.bf16.msra.mxu0 %v4481_v27 }
 0xf3f   : > { %4108 = vmatprep.subr.bf16.mxu0 %v4739_v4  ;;  %4127 = vmatpush3.bf16.msra.mxu1 %v4489_v38 }
 0xf40   : > { %4128 = vmatprep.subr.bf16.mxu1 %v4739_v4 }
 0xf42   : > { %4109 = vmatpush3.bf16.msra.mxu0 %v4482_v29 }
 0xf43   : > { %4110 = vmatprep.subr.bf16.mxu0 %v4739_v4  ;;  %4129 = vmatpush3.bf16.msra.mxu1 %v4490_v41 }
 0xf44   : > { %4130 = vmatprep.subr.bf16.mxu1 %v4739_v4 }
 0xf46   : > { %4111 = vmatpush3.bf16.msra.mxu0 %v4483_v31 }
 0xf47   : > { %4112 = vmatprep.subr.bf16.mxu0 %v4739_v4  ;;  %4131 = vmatpush3.bf16.msra.mxu1 %v4491_v44 }
 0xf48   : > { %4132 = vmatprep.subr.bf16.mxu1 %v4739_v4 }
 0xf4a   : > { %4113 = vmatpush3.bf16.msra.mxu0 %v4484_v32 }
 0xf4b   : > { %4114 = vmatprep.subr.bf16.mxu0 %v4739_v4  ;;  %4133 = vmatpush3.bf16.msra.mxu1 %v4492_v45 }
 0xf4c   : > { %4134 = vmatprep.subr.bf16.mxu1 %v4739_v4 }
 0xf4e   : > { %4115 = vmatpush3.bf16.msra.mxu0 %v4485_v33 }
 0xf4f   : > { %4116 = vmatprep.subr.bf16.mxu0 %v4739_v4  ;;  %4135 = vmatpush3.bf16.msra.mxu1 %v4493_v54 }
 0xf50   : > { %4136 = vmatprep.subr.bf16.mxu1 %v4739_v4 }
 0xf52   : > { %4117 = vmatpush3.bf16.msra.mxu0 %v4486_v34 }
 0xf53   : > { %4137 = vmatpush3.bf16.msra.mxu1 %v4494_v61 }
0x1007   : > { %v2902_v58 = vpop.f32.mrb[60].mxu0 }
0x1008   : > { %v2908_v60 = vadd.f32 %v2902_v58, %v5258_v8  ;;  %v4068_v0 = vpop.f32.mrb[61].mxu0  ;;  %v3105_v62 = vpop.f32.mrb[60].mxu1 }
0x1009   : > { %v2905_v5 = vpop.f32.mrb[62].mxu0  ;;  %v4100_v9 = vpop.f32.mrb[61].mxu1 }
0x100a   : > { %v3111_v25 = vadd.f32 %v3105_v62, %v2908_v60  ;;  %v4069_v11 = vpop.f32.mrb[63].mxu0  ;;  %v3108_v14 = vpop.f32.mrb[62].mxu1  ;;  %v3344_v62 = vld [vmem:[#allocation8 + $0x41] ss:$0 sm:$0xff]  ;;  %v3345_v9 = vld [vmem:[#allocation8 + $0x42] ss:$0 sm:$0xff] }
0x100b   : > { %v4101_v15 = vpop.f32.mrb[63].mxu1 }
0x100c   : > { %v5292_v16 = vadd.f32 %v3111_v25, %v5152_v51 }
0x100e   : > { %3116 = vadd.xlane.f32.xlu0 %v5292_v16 }
0x109b   : > { %v3117_v8 = vpop.xlane.xlu0 %3116 }
0x109c   : > { %v3118_v20 = vmul.f32 0.03125, %v3117_v8 }
0x109e   : > { %v3119_v24 = vsub.f32 %v5292_v16, %v3118_v20 }
0x10a0   : > { %v3120_v26 = vmul.f32 %v3119_v24, %v5297_v22 }
0x10a2   : > { %v3121_v51 = vmul.f32 %v3120_v26, %v3120_v26 }
0x10a4   : > { %3122 = vadd.xlane.f32.xlu1 %v3121_v51 }
0x1131   : > { %v3123_v46 = vpop.xlane.xlu1 %3122 }
0x1132   : > { %v3124_v47 = vmul.f32 0.03125, %v3123_v46 }
0x1134   : > { %v3125_v48 = vadd.f32 1e-05, %v3124_v47 }
0x1136   : > { %4527 = vrsqrt.f32 %v3125_v48 }
0x1140   : > { %v4528_v49 = vpop.eup %4527 }
0x1141   : > { %v3127_v50 = vmul.f32 %v4528_v49, %v3120_v26 }
0x1143   : > { %v3128_v52 = vmul.f32 %v3127_v50, %v3114_v39 }
0x1145   : > { %v3129_v53 = vadd.f32 %v3128_v52, %v3115_v12 }
0x1147   : > { %v3130_v40 = vpack.c.bf16 %v3129_v53, %v3129_v53 }
0x1149   : > { %4119 = vmatmul.mubr.bf16.vlgmr.msra.gmra.mrb[64].mxu0 %v3130_v40 }
0x121c   : > { %v3230_v21 = vpop.f32.mrb[64].mxu0 }
0x121d   : > { %v3231_v23 = vadd.f32 %v3230_v21, %v3147_v55  ;;  %v4120_v10 = vpop.f32.mrb[65].mxu0 }
0x121e   : > { %v3233_v19 = vpop.f32.mrb[66].mxu0 }
0x121f   : > { %v3236_v57 = vmax.f32 %v3231_v23, 0.0  ;;  %v4121_v59 = vpop.f32.mrb[67].mxu0 }
0x1221   : > { %v3237_v1 = vpack.c.bf16 %v3236_v57, %v3236_v57 }
0x1223   : > { %4139 = vmatmul.mubr.bf16.vlgmr.msra.gmra.mrb[64].mxu1 %v3237_v1 }
0x12f6   : > { %v3337_v3 = vpop.f32.mrb[64].mxu1 }
0x12f7   : > { %v3338_v63 = vadd.f32 %v3337_v3, %v3254_v2  ;;  %v4140_v6 = vpop.f32.mrb[65].mxu1 }
0x12f8   : > { %v3340_v7 = vpop.f32.mrb[66].mxu1 }
0x12f9   : > { %v4141_v35 = vpop.f32.mrb[67].mxu1  ;;  %v3343_v42 = vadd.f32 %v3338_v63, %v5292_v16 }
0x12fb   : > { %3346 = vadd.xlane.f32.xlu0 %v3343_v42 }
0x1388   : > { %v3347_v4 = vpop.xlane.xlu0 %3346 }
0x1389   : > { %v3348_v43 = vmul.f32 0.03125, %v3347_v4 }
0x138b   : > { %v3349_v13 = vsub.f32 %v3343_v42, %v3348_v43 }
0x138d   : > { %v3350_v28 = vmul.f32 %v3349_v13, %v5297_v22 }
0x138f   : > { %v3351_v30 = vmul.f32 %v3350_v28, %v3350_v28 }
0x1391   : > { %3352 = vadd.xlane.f32.xlu1 %v3351_v30 }
0x141e   : > { %v3353_v56 = vpop.xlane.xlu1 %3352 }
0x141f   : > { %v3354_v58 = vmul.f32 0.03125, %v3353_v56 }
0x1421   : > { %v3355_v60 = vadd.f32 1e-05, %v3354_v58 }
0x1423   : > { %4529 = vrsqrt.f32 %v3355_v60 }
0x142d   : > { %v4530_v0 = vpop.eup %4529 }
0x142e   : > { %v3357_v5 = vmul.f32 %v4530_v0, %v3350_v28 }
0x1430   : > { %v3358_v25 = vmul.f32 %v3357_v5, %v3344_v62 }
0x1432   : > { %v3359_v11 = vadd.f32 %v3358_v25, %v3345_v9 }
0x1434   : > { %3360 = vst [vmem:[%s281_s12] sm:$0xff] %v3359_v11 }
0x1435   : > { %4661 = shalt.err (!%p4658_p5)
}
0x1436   : > { %s4662_s26 = scalar_lea.hbm %s5321_s24, 128  ;;  %s4666_s23 = scalar_lea.hbm %s5369_s4, 256 }
0x1437   : > { %p4663_p9 = scmp.ne.s32.totalorder %s5321_s24, %s4662_s26  ;;  %p4667_p11 = scmp.lt.u32.totalorder %s5321_s24, %s5369_s4 }
0x1438   : > { %p4668_p1 = scmp.lt.u32.totalorder %s4666_s23, %s4662_s26  ;;  %p4670_p2 = scmp.lt.u32.totalorder %s4662_s26, %s5321_s24 }
0x1439   : > { %p4664_p0 = pnand %p4663_p9, %p5385_p13 }
0x143a   : > { %p4669_p12 = por %p4668_p1, %p4667_p11 }
0x143b   : > { %p4665_p8 = pneg %p4664_p0 }
0x143c   : > { %p4671_p6 = por %p4670_p2, %p4669_p12 }
0x143e   : > { %p4672_p10 = pnand %p4671_p6, %p4665_p8 }
0x1440   : > { %4675 = shalt.err (!%p4672_p10)
}
0x1441   : > { %4154 = dma.vmem_to_hbm [thread:$0]  (%p5385_p13), %s5323_s9, 128, %s5321_s24, %s3362_s27  }
0x1442 PF: > { %s3387_s5 = sand.u32 1, %s4714_s15   ;;  %p5386_p4 = scmp.ne.s32.totalorder %s5374_s22, 0 }
0x1443   : > { %p5387_p7 = scmp.ge.s32.totalorder %s4726_s18, 2  ;;  %s3388_s21 = scalar_lea.sflag [#allocation4], %s3387_s5 }
0x1445   : > { %p4171_p3 = pnand %p5387_p7, %p5386_p4 }
0x1447   : > { %4709 = dma.done.wait (!%p4171_p3), %s3388_s21, 128  }
0x1448   : > { %4711 = vsyncadd (!%p4171_p3), %s3388_s21, 4294967168  ;;  %p21_p5 = scmp.ge.s32.totalorder %s4877_s11, 4   ;;  %s5388_s15 = smov %s4718_s16 }
0x1449   : > { %s5389_s16 = smov %s4722_s17  ;;  %s5390_s17 = smov %s4886_s14 }
0x144a   : > { %s5391_s18 = smov %s4877_s11  ;;  %23 = sbr.rel (!%p21_p5) target bundleno = 8 (0x8), region = 104 }
0x1451   :  { %3393 = vsyncpa [#allocation3], 1 }
0x1452   :  { %3395 = vsyncpa [#allocation3 + $0x1], 1 }
0x1453   :  { %3396 = vsyncpa [#allocation6], 1 }
0x1454   :  { %3398 = vsyncpa [#allocation6 + $0x1], 1 }
0x1455   :  { %3399 = vsyncpa [#allocation9], 1 }
0x1456   :  { %3400 = vsyncpa [#allocation4], 1 }
0x1457   :  { %3402 = vsyncpa [#allocation4 + $0x1], 1 }

</bundles_post_ra>
